<compile_context>
chip_gen: v7x
topology: tpu7x:2x2x1
jax: 0.10.0
libtpu: 0.0.40
codegen_flags: <defaults>
</compile_context>

<pallas_src>
import math

import jax
import jax.numpy as jnp
from jax import lax
from jax.experimental import pallas as pl
from jax.experimental.pallas import tpu as pltpu


# ----------------------------------------------------------------------------
# helpers
# ----------------------------------------------------------------------------

def find_multiple(n, k):
    return n if n % k == 0 else n + k - (n % k)


def _pick_tile(dim, preferred, align):
    """Largest tile <= preferred that divides `dim` and is `align`-aligned,
    falling back to the full dim (full dims always satisfy the (8,128) rule).
    NOTE: the full-dim fallback can produce large blocks for big prime-ish
    dims; pad such dims upstream if that ever happens."""
    if dim <= preferred:
        return dim
    t = (preferred // align) * align
    while t >= align:
        if dim % t == 0:
            return t
        t -= align
    return dim


def _vmem_limit_bytes():
    """Scoped VMEM budget: about half of physical VMEM per core.
    v5e/v6e (128 MiB physical) -> 64 MiB; v7x (64 MiB) -> 32 MiB."""
    try:
        cap = pltpu.get_tpu_info().vmem_capacity_bytes
        mib = max(32, min(96, cap // (2 * 1024 * 1024)))
        return int(mib) * 1024 * 1024
    except Exception:
        return 32 * 1024 * 1024


_VMEM_LIMIT = _vmem_limit_bytes()


def _cparams(dims):
    return pltpu.CompilerParams(dimension_semantics=dims,
                                vmem_limit_bytes=_VMEM_LIMIT)


# ----------------------------------------------------------------------------
# kernels
# ----------------------------------------------------------------------------

def _rmsnorm_matmul_kernel(x_ref, scale_ref, w_ref, o_ref):
    """o = rmsnorm(x) @ W   (norm in f32, matmul in bf16 with f32 accumulate)."""
    x = x_ref[...].astype(jnp.float32)                       # (tm, C)
    ms = jnp.mean(x * x, axis=-1, keepdims=True)
    xn = x * lax.rsqrt(ms + 1e-5) * scale_ref[...].astype(jnp.float32)
    o_ref[...] = jnp.dot(xn.astype(w_ref.dtype), w_ref[...],
                         preferred_element_type=jnp.float32).astype(o_ref.dtype)


def _matmul_residual_kernel(x_ref, w_ref, res_ref, o_ref, acc_ref):
    """Tiled o = res + x @ W (residual add in f32, K-reduction accumulator)."""
    @pl.when(pl.program_id(2) == 0)
    def _():
        acc_ref[...] = jnp.zeros_like(acc_ref)

    acc_ref[...] += jnp.dot(x_ref[...], w_ref[...],
                            preferred_element_type=jnp.float32)

    @pl.when(pl.program_id(2) == pl.num_programs(2) - 1)
    def _():
        o_ref[...] = (res_ref[...].astype(jnp.float32)
                      + acc_ref[...]).astype(o_ref.dtype)


def _rmsnorm_mlp_residual_kernel(x_ref, scale_ref, w1_ref, w2_ref, w3_ref,
                                 o_ref, acc_ref, xn_ref):
    """o = x + (silu(rmsnorm(x)@W1) * (rmsnorm(x)@W2)) @ W3, tiled over the
    hidden dimension (grid axis 1, f32 accumulator).  x doubles as the
    residual; rmsnorm(x) is computed once per row-block into xn_ref."""
    h_idx = pl.program_id(1)

    @pl.when(h_idx == 0)
    def _():
        acc_ref[...] = jnp.zeros_like(acc_ref)
        x = x_ref[...].astype(jnp.float32)                    # (tm, C)
        ms = jnp.mean(x * x, axis=-1, keepdims=True)
        xn_ref[...] = (x * lax.rsqrt(ms + 1e-5)
                       * scale_ref[...].astype(jnp.float32)).astype(xn_ref.dtype)

    xn = xn_ref[...]                                          # (tm, C) bf16
    h1 = jnp.dot(xn, w1_ref[...], preferred_element_type=jnp.float32)  # (tm, th)
    h2 = jnp.dot(xn, w2_ref[...], preferred_element_type=jnp.float32)
    silu = h1 * pl.reciprocal(1.0 + jnp.exp(-h1), approx=True)         # f32 silu
    g = (silu * h2).astype(w3_ref.dtype)
    acc_ref[...] += jnp.dot(g, w3_ref[...], preferred_element_type=jnp.float32)

    @pl.when(h_idx == pl.num_programs(1) - 1)
    def _():
        o_ref[...] = (x_ref[...].astype(jnp.float32)
                      + acc_ref[...]).astype(o_ref.dtype)


def _flash_adapter_attn_kernel(q_ref, k_ref, v_ref, ak_ref, av_ref, o_ref,
                               m_ref, l_ref, acc_ref):
    """Flash-style causal attention + adapter-prompt attention, head-packed.

    grid = (B, H//Hc, T//tq, T//tk) with tq == tk; one (batch, head-group,
    q-block) owns the scratch accumulators across the kv axis.  Fully-masked
    above-diagonal kv blocks (ki > qi) are skipped; their K/V DMA is elided by
    the clamped index_map in the wrapper.  Adapter attention (aT small,
    un-tiled, gating pre-folded into av) is added at the final kv step.
    """
    qi = pl.program_id(2)
    ki = pl.program_id(3)

    @pl.when(ki == 0)
    def _():
        m_ref[...] = jnp.full(m_ref.shape, -jnp.inf, m_ref.dtype)
        l_ref[...] = jnp.zeros_like(l_ref)
        acc_ref[...] = jnp.zeros_like(acc_ref)

    q = q_ref[0]                                              # (Hc, tq, hs) bf16
    hc, t_q, hs = q.shape
    scale = 1.0 / math.sqrt(hs)

    @pl.when(ki <= qi)                                        # causal block skip
    def _():
        k = k_ref[0]                                          # (Hc, tk, hs)
        t_k = k.shape[1]
        s = jnp.einsum('hqd,hkd->hqk', q, k,
                       preferred_element_type=jnp.float32) * scale   # (Hc,tq,tk)
        row = qi * t_q + lax.broadcasted_iota(jnp.int32, (1, t_q, t_k), 1)
        col = ki * t_k + lax.broadcasted_iota(jnp.int32, (1, t_q, t_k), 2)
        s = jnp.where(row >= col, s, -1e30)                   # in-kernel causal mask

        m_prev = m_ref[...]                                   # (Hc, tq, 1)
        m_new = jnp.maximum(m_prev, jnp.max(s, axis=-1, keepdims=True))
        alpha = jnp.exp(m_prev - m_new)
        p = jnp.exp(s - m_new)
        l_ref[...] = alpha * l_ref[...] + jnp.sum(p, axis=-1, keepdims=True)
        acc_ref[...] = alpha * acc_ref[...] + jnp.einsum(
            'hqk,hkd->hqd', p.astype(v_ref.dtype), v_ref[0],
            preferred_element_type=jnp.float32)
        m_ref[...] = m_new

    @pl.when(ki == pl.num_programs(3) - 1)
    def _():
        # adapter-prompt attention (not causal, aT small).  av already carries
        # the per-head gating factor, so the result adds directly.
        ak = ak_ref[...]                                      # (Hc, aT, hs)
        av = av_ref[...]
        sa = jnp.einsum('hqd,hkd->hqk', q, ak,
                        preferred_element_type=jnp.float32) * scale  # (Hc,tq,aT)
        sa = sa - jnp.max(sa, axis=-1, keepdims=True)
        pa = jnp.exp(sa)
        pa = pa * pl.reciprocal(jnp.sum(pa, axis=-1, keepdims=True), approx=True)
        ay = jnp.einsum('hqk,hkd->hqd', pa.astype(av.dtype), av,
                        preferred_element_type=jnp.float32)   # (Hc, tq, hs)

        y = acc_ref[...] * pl.reciprocal(l_ref[...], approx=True) + ay
        o_ref[0] = y.astype(o_ref.dtype)


# ----------------------------------------------------------------------------
# wrappers
# ----------------------------------------------------------------------------

def fused_rmsnorm_matmul(x, scale, w, out_dtype):
    M, K = x.shape
    N = w.shape[1]
    tm = _pick_tile(M, 256, 8)
    tn = _pick_tile(N, 512, 128)

    def est(tm_, tn_):
        return 2 * (tm_ * K * x.dtype.itemsize + K * tn_ * w.dtype.itemsize
                    + tm_ * tn_ * jnp.dtype(out_dtype).itemsize)

    # shrink against the scoped-VMEM budget (matters for large C on v7x)
    while est(tm, tn) > 0.7 * _VMEM_LIMIT and tn > 128 and N % (tn // 2) == 0:
        tn //= 2
    while est(tm, tn) > 0.7 * _VMEM_LIMIT and tm > 8 and M % (tm // 2) == 0:
        tm //= 2

    return pl.pallas_call(
        _rmsnorm_matmul_kernel,
        out_shape=jax.ShapeDtypeStruct((M, N), out_dtype),
        grid=(M // tm, N // tn),
        in_specs=[
            pl.BlockSpec((tm, K), lambda i, j: (i, 0)),
            pl.BlockSpec((1, K), lambda i, j: (0, 0)),
            pl.BlockSpec((K, tn), lambda i, j: (0, j)),
        ],
        out_specs=pl.BlockSpec((tm, tn), lambda i, j: (i, j)),
        compiler_params=_cparams(("parallel", "parallel")),
    )(x, scale, w)


def matmul_residual_tiled(x, w, res):
    M, K = x.shape
    N = w.shape[1]
    tm = _pick_tile(M, 512, 16)       # x is bf16: 16-aligned sublane packing
    tn = _pick_tile(N, 512, 128)
    tk = _pick_tile(K, 512, 128)
    return pl.pallas_call(
        _matmul_residual_kernel,
        out_shape=jax.ShapeDtypeStruct((M, N), res.dtype),
        grid=(M // tm, N // tn, K // tk),
        in_specs=[
            pl.BlockSpec((tm, tk), lambda i, j, k: (i, k)),
            pl.BlockSpec((tk, tn), lambda i, j, k: (k, j)),
            pl.BlockSpec((tm, tn), lambda i, j, k: (i, j)),
        ],
        out_specs=pl.BlockSpec((tm, tn), lambda i, j, k: (i, j)),
        scratch_shapes=[pltpu.VMEM((tm, tn), jnp.float32)],
        compiler_params=_cparams(("parallel", "parallel", "arbitrary")),
    )(x, w, res)


def fused_rmsnorm_mlp_residual(x, scale, w1, w2, w3):
    """x is both the normed input and the residual (single input stream)."""
    M, C = x.shape
    NH = w1.shape[1]
    tm = _pick_tile(M, 256, 8)
    th = _pick_tile(NH, 512, 128)

    def est(tm_, th_):
        # x/out f32 double-buffered + w1/w2/w3 bf16 double-buffered
        # + f32 acc scratch + bf16 xn scratch
        return (2 * 2 * tm_ * C * 4
                + 2 * (2 * C * th_ + th_ * C) * w1.dtype.itemsize
                + tm_ * C * 4 + tm_ * C * 2)

    # re-derive tiles against the scoped-VMEM budget (v7x: 64 MiB physical)
    while est(tm, th) > 0.7 * _VMEM_LIMIT and th > 128 and NH % (th // 2) == 0:
        th //= 2
    while est(tm, th) > 0.7 * _VMEM_LIMIT and tm > 8 and M % (tm // 2) == 0:
        tm //= 2

    return pl.pallas_call(
        _rmsnorm_mlp_residual_kernel,
        out_shape=jax.ShapeDtypeStruct((M, C), x.dtype),
        grid=(M // tm, NH // th),
        in_specs=[
            pl.BlockSpec((tm, C), lambda i, h: (i, 0)),
            pl.BlockSpec((1, C), lambda i, h: (0, 0)),
            pl.BlockSpec((C, th), lambda i, h: (0, h)),
            pl.BlockSpec((C, th), lambda i, h: (0, h)),
            pl.BlockSpec((th, C), lambda i, h: (h, 0)),
        ],
        out_specs=pl.BlockSpec((tm, C), lambda i, h: (i, 0)),
        scratch_shapes=[pltpu.VMEM((tm, C), jnp.float32),    # acc (f32)
                        pltpu.VMEM((tm, C), w1.dtype)],      # rmsnorm(x) (bf16)
        compiler_params=_cparams(("parallel", "arbitrary")),
    )(x, scale, w1, w2, w3)


def flash_attention_with_adapter(q, k, v, ak, av_scaled):
    """q/k/v: (B, H, T, hs); ak/av_scaled: (H, aT, hs) compact, gating folded
    into av_scaled.  Returns (B, H, T, hs)."""
    B, H, T, hs = q.shape
    aT = ak.shape[1]

    # head packing: when hs < 128, process Hc heads per grid step so each step
    # feeds the MXU a batched (Hc, tq, hs) block and DMA blocks get larger.
    hc = max(1, min(H, 128 // hs)) if hs < 128 else 1
    while H % hc != 0:
        hc -= 1
    G = H // hc

    tq = _pick_tile(T, 256, 16)       # bf16: 16-aligned sublane packing
    tk = tq                           # equal tiles -> simple ki<=qi causal skip

    def kv_index(b, g, qi, ki):
        # clamp above-diagonal (fully masked) kv blocks to the last useful one
        # so their DMA is elided (same block index as the previous step).
        return (b, g, jnp.minimum(ki, qi), 0)

    return pl.pallas_call(
        _flash_adapter_attn_kernel,
        out_shape=jax.ShapeDtypeStruct((B, H, T, hs), q.dtype),
        grid=(B, G, T // tq, T // tk),
        in_specs=[
            pl.BlockSpec((1, hc, tq, hs), lambda b, g, qi, ki: (b, g, qi, 0)),
            pl.BlockSpec((1, hc, tk, hs), kv_index),
            pl.BlockSpec((1, hc, tk, hs), kv_index),
            pl.BlockSpec((hc, aT, hs), lambda b, g, qi, ki: (g, 0, 0)),
            pl.BlockSpec((hc, aT, hs), lambda b, g, qi, ki: (g, 0, 0)),
        ],
        out_specs=pl.BlockSpec((1, hc, tq, hs), lambda b, g, qi, ki: (b, g, qi, 0)),
        scratch_shapes=[
            pltpu.VMEM((hc, tq, 1), jnp.float32),     # m (running max)
            pltpu.VMEM((hc, tq, 1), jnp.float32),     # l (running denom)
            pltpu.VMEM((hc, tq, hs), jnp.float32),    # acc
        ],
        compiler_params=_cparams(("parallel", "parallel", "parallel", "arbitrary")),
    )(q, k, v, ak, av_scaled)


# ----------------------------------------------------------------------------
# glue (pure JAX)
# ----------------------------------------------------------------------------

def build_rope_cache(seq_len, n_elem, base=10000.0):
    theta = 1.0 / (base ** (jnp.arange(0, n_elem, 2, dtype=jnp.float32) / n_elem))
    idx_theta = jnp.outer(jnp.arange(seq_len, dtype=jnp.float32), theta)
    return jnp.stack([jnp.cos(idx_theta), jnp.sin(idx_theta)], axis=-1)  # (T, hs/2, 2)


def apply_rope(x, rope):
    # x: (B, T, H, hs); rope: (T, hs/2, 2); interleaved pairing like lit_llama
    B, T, H, hs = x.shape
    x2 = x.astype(jnp.float32).reshape(B, T, H, hs // 2, 2)
    cos = rope[None, :, None, :, 0]
    sin = rope[None, :, None, :, 1]
    out = jnp.stack([x2[..., 0] * cos - x2[..., 1] * sin,
                     x2[..., 1] * cos + x2[..., 0] * sin], axis=-1)
    return out.reshape(B, T, H, hs).astype(x.dtype)


@jax.jit
def block_forward(params, x, rope):
    B, T, C = x.shape
    H = params["gating_factor"].shape[1]
    hs = C // H
    x2d = x.reshape(B * T, C)                                   # f32 residual stream

    # --- rms_1 fused into the QKV projection (bf16 MXU, f32 norm) ---
    qkv = fused_rmsnorm_matmul(x2d, params["rms1_scale"], params["w_attn"],
                               out_dtype=jnp.bfloat16)          # (B*T, 3C)
    q = qkv[:, :C].reshape(B, T, H, hs)
    k = qkv[:, C:2 * C].reshape(B, T, H, hs)
    v = qkv[:, 2 * C:].reshape(B, T, H, hs)
    q = apply_rope(q, rope).transpose(0, 2, 1, 3)               # (B, H, T, hs)
    k = apply_rope(k, rope).transpose(0, 2, 1, 3)
    v = v.transpose(0, 2, 1, 3)

    # adapter prefix through the same c_attn (only k/v used).  M=aT=10 rows ->
    # plain XLA matmul; XLA fuses the slice / transpose / gating fold.
    aT = params["adapter_wte"].shape[0]
    a_qkv = jnp.dot(params["adapter_wte"], params["w_attn"],
                    preferred_element_type=jnp.float32)         # (aT, 3C) f32
    ak = a_qkv[:, C:2 * C].reshape(aT, H, hs).transpose(1, 0, 2)    # (H, aT, hs)
    av = a_qkv[:, 2 * C:].reshape(aT, H, hs).transpose(1, 0, 2)
    # fold per-head gating into adapter V:  g * softmax(qk)V == softmax(qk)(gV)
    gate = params["gating_factor"][0, :, 0, 0].astype(jnp.float32)  # (H,)
    av_scaled = (av * gate[:, None, None]).astype(jnp.bfloat16)
    ak_b = ak.astype(jnp.bfloat16)

    y = flash_attention_with_adapter(q, k, v, ak_b, av_scaled)  # (B, H, T, hs)
    # TODO(synk): emit y directly in (B, T, H, hs) from the kernel (in-kernel
    # (Hc,tq,hs)->(tq,Hc,hs) transpose) to drop this XLA transpose HBM pass.
    y2d = y.transpose(0, 2, 1, 3).reshape(B * T, C)

    # attention output projection + residual (f32)
    x2d = matmul_residual_tiled(y2d, params["w_proj"], x2d)

    # --- rms_2 fused into the SwiGLU MLP + residual (x2d is the residual) ---
    x2d = fused_rmsnorm_mlp_residual(x2d, params["rms2_scale"],
                                     params["w_fc1"], params["w_fc2"],
                                     params["w_mlp_proj"])

    out = x2d.reshape(B, T, C)
    # adapter kv cache kept compact (H, aT, hs); broadcast to (B, H, aT, hs)
    # only if a downstream consumer really needs per-batch replicas.
    adapter_kv_cache = (ak_b, av.astype(jnp.bfloat16))
    return out, None, adapter_kv_cache      # (x, kv_cache, adapter_kv_cache)


# ----------------------------------------------------------------------------
# main
# ----------------------------------------------------------------------------

if __name__ == "__main__":
    B, T, C, H = 2, 16, 128, 4          # batch, seq, n_embd, n_head
    hs = C // H
    aT = 10                             # adapter_prompt_length
    n_hidden = find_multiple(int(2 * (4 * C) / 3), 256)   # lit_llama MLP sizing

    key = jax.random.PRNGKey(0)
    ks = jax.random.split(key, 8)
    params = {
        "rms1_scale": jnp.ones((1, C), jnp.float32),
        "rms2_scale": jnp.ones((1, C), jnp.float32),
        # weights stored as (in, out) = W^T of nn.Linear, bf16 for the MXU
        "w_attn": (0.02 * jax.random.normal(ks[0], (C, 3 * C))).astype(jnp.bfloat16),
        "w_proj": (0.02 * jax.random.normal(ks[1], (C, C))).astype(jnp.bfloat16),
        "adapter_wte": (0.02 * jax.random.normal(ks[2], (aT, C))).astype(jnp.bfloat16),
        # torch init is zeros; nonzero, per-head-distinct here so the folded
        # gating path is actually exercised
        "gating_factor": (0.05 * (1.0 + jnp.arange(H, dtype=jnp.float32))
                          ).reshape(1, H, 1, 1),
        "w_fc1": (0.02 * jax.random.normal(ks[3], (C, n_hidden))).astype(jnp.bfloat16),
        "w_fc2": (0.02 * jax.random.normal(ks[4], (C, n_hidden))).astype(jnp.bfloat16),
        "w_mlp_proj": (0.02 * jax.random.normal(ks[5], (n_hidden, C))).astype(jnp.bfloat16),
    }

    x = jax.random.normal(ks[6], (B, T, C), jnp.float32)
    rope = build_rope_cache(T, hs)

    out, kv_cache, adapter_kv_cache = block_forward(params, x, rope)
    jax.block_until_ready(out)
    assert out.shape == (B, T, C)
    assert adapter_kv_cache[0].shape == (H, aT, hs)
    assert adapter_kv_cache[1].shape == (H, aT, hs)
    assert bool(jnp.all(jnp.isfinite(out)))
    print("KERNEL_OK")
</pallas_src>

<mosaic_0001>
module attributes {stable_mosaic.version = 11 : i64} {
  func.func @_rmsnorm_matmul_kernel(%arg0: i32, %arg1: i32, %arg2: memref<32x128xf32, #tpu.memory_space<vmem>>, %arg3: memref<1x128xf32, #tpu.memory_space<vmem>>, %arg4: memref<128x384xbf16, #tpu.memory_space<vmem>>, %arg5: memref<32x384xbf16, #tpu.memory_space<vmem>>) attributes {dimension_semantics = [#tpu.dimension_semantics<parallel>, #tpu.dimension_semantics<parallel>], iteration_bounds = array<i64: 1, 1>, scalar_prefetch = 0 : i64, scratch_operands = 0 : i64, tpu.core_type = #tpu.core_type<tc>, window_params = [{transform_indices = @transform_0, window_bounds = array<i64: 32, 128>}, {pipeline_mode = #tpu.pipeline_mode<synchronous>, transform_indices = @transform_1, window_bounds = array<i64: 1, 128>}, {transform_indices = @transform_2, window_bounds = array<i64: 128, 384>}, {transform_indices = @transform_3, window_bounds = array<i64: 32, 384>}]} {
    %c0 = arith.constant 0 : index
    %c0_0 = arith.constant 0 : index
    %0 = vector.load %arg2[%c0, %c0_0] : memref<32x128xf32, #tpu.memory_space<vmem>>, vector<32x128xf32>
    %1 = arith.mulf %0, %0 : vector<32x128xf32>
    %cst = arith.constant dense<0.000000e+00> : vector<32xf32>
    %2 = vector.multi_reduction <add>, %1, %cst [1] : vector<32x128xf32> to vector<32xf32>
    %3 = vector.shape_cast %2 : vector<32xf32> to vector<32x1xf32>
    %cst_1 = arith.constant 1.280000e+02 : f32
    %4 = vector.broadcast %cst_1 : f32 to vector<32x1xf32>
    %5 = arith.divf %3, %4 : vector<32x1xf32>
    %cst_2 = arith.constant 9.99999974E-6 : f32
    %6 = vector.broadcast %cst_2 : f32 to vector<32x1xf32>
    %7 = arith.addf %5, %6 : vector<32x1xf32>
    %8 = math.rsqrt %7 : vector<32x1xf32>
    %9 = vector.broadcast %8 : vector<32x1xf32> to vector<32x128xf32>
    %10 = arith.mulf %0, %9 : vector<32x128xf32>
    %c0_3 = arith.constant 0 : index
    %c0_4 = arith.constant 0 : index
    %11 = vector.load %arg3[%c0_3, %c0_4] : memref<1x128xf32, #tpu.memory_space<vmem>>, vector<1x128xf32>
    %12 = vector.broadcast %11 : vector<1x128xf32> to vector<32x128xf32>
    %13 = arith.mulf %10, %12 : vector<32x128xf32>
    %14 = arith.truncf %13 : vector<32x128xf32> to vector<32x128xbf16>
    %c0_5 = arith.constant 0 : index
    %c0_6 = arith.constant 0 : index
    %15 = vector.load %arg4[%c0_5, %c0_6] : memref<128x384xbf16, #tpu.memory_space<vmem>>, vector<128x384xbf16>
    %cst_7 = arith.constant dense<0.000000e+00> : vector<32x384xf32>
    %16 = tpu.matmul %14, %15, %cst_7 {dimension_numbers = #tpu.dot_dimension_numbers<[1], [0], [0], [1], [0, 0, 1, 1], [], []>} : vector<32x128xbf16>, vector<128x384xbf16>, vector<32x384xf32> -> vector<32x384xf32>
    %17 = arith.truncf %16 : vector<32x384xf32> to vector<32x384xbf16>
    %c0_8 = arith.constant 0 : index
    %c0_9 = arith.constant 0 : index
    %18 = vector.load %arg5[%c0_8, %c0_9] : memref<32x384xbf16, #tpu.memory_space<vmem>>, vector<32x384xbf16>
    tpu.vector_store %arg5[%c0_8, %c0_9], %17 {strides = array<i32>} : memref<32x384xbf16, #tpu.memory_space<vmem>>, vector<32x384xbf16>,
    return
  }
  func.func @transform_0(%arg0: i32, %arg1: i32) -> (i32, i32) {
    %c0_i32 = arith.constant 0 : i32
    %c0_i32_0 = arith.constant 0 : i32
    return %arg0, %c0_i32 : i32, i32
  }
  func.func @transform_1(%arg0: i32, %arg1: i32) -> (i32, i32) {
    %c0_i32 = arith.constant 0 : i32
    %c0_i32_0 = arith.constant 0 : i32
    %c0_i32_1 = arith.constant 0 : i32
    return %c0_i32, %c0_i32_0 : i32, i32
  }
  func.func @transform_2(%arg0: i32, %arg1: i32) -> (i32, i32) {
    %c0_i32 = arith.constant 0 : i32
    %c0_i32_0 = arith.constant 0 : i32
    return %c0_i32, %arg1 : i32, i32
  }
  func.func @transform_3(%arg0: i32, %arg1: i32) -> (i32, i32) {
    %c0_i32 = arith.constant 0 : i32
    return %arg0, %arg1 : i32, i32
  }
}

module attributes {stable_mosaic.version = 11 : i64} {
  func.func @_flash_adapter_attn_kernel(%arg0: i32, %arg1: i32, %arg2: i32, %arg3: i32, %arg4: memref<1x4x16x32xbf16, #tpu.memory_space<vmem>>, %arg5: memref<1x4x16x32xbf16, #tpu.memory_space<vmem>>, %arg6: memref<1x4x16x32xbf16, #tpu.memory_space<vmem>>, %arg7: memref<4x10x32xbf16, #tpu.memory_space<vmem>>, %arg8: memref<4x10x32xbf16, #tpu.memory_space<vmem>>, %arg9: memref<1x4x16x32xbf16, #tpu.memory_space<vmem>>, %arg10: memref<4x16x1xf32, #tpu.memory_space<vmem>>, %arg11: memref<4x16x1xf32, #tpu.memory_space<vmem>>, %arg12: memref<4x16x32xf32, #tpu.memory_space<vmem>>) attributes {dimension_semantics = [#tpu.dimension_semantics<parallel>, #tpu.dimension_semantics<parallel>, #tpu.dimension_semantics<parallel>, #tpu.dimension_semantics<arbitrary>], iteration_bounds = array<i64: 2, 1, 1, 1>, scalar_prefetch = 0 : i64, scratch_operands = 3 : i64, tpu.core_type = #tpu.core_type<tc>, window_params = [{transform_indices = @transform_0, window_bounds = array<i64: 1, 4, 16, 32>}, {transform_indices = @transform_1, window_bounds = array<i64: 1, 4, 16, 32>}, {transform_indices = @transform_2, window_bounds = array<i64: 1, 4, 16, 32>}, {transform_indices = @transform_3, window_bounds = array<i64: 4, 10, 32>}, {transform_indices = @transform_4, window_bounds = array<i64: 4, 10, 32>}, {transform_indices = @transform_5, window_bounds = array<i64: 1, 4, 16, 32>}]} {
    %c0_i32 = arith.constant 0 : i32
    %0 = arith.cmpi eq, %arg3, %c0_i32 : i32
    %1 = arith.extui %0 : i1 to i32
    %c0_i32_0 = arith.constant 0 : i32
    %2 = arith.cmpi ne, %1, %c0_i32_0 : i32
    scf.if %2 {
      %cst = arith.constant 0xFF800000 : f32
      %11 = vector.broadcast %cst : f32 to vector<4x16x1xf32>
      %c0_7 = arith.constant 0 : index
      %c0_8 = arith.constant 0 : index
      %c0_9 = arith.constant 0 : index
      %12 = vector.load %arg10[%c0_7, %c0_8, %c0_9] : memref<4x16x1xf32, #tpu.memory_space<vmem>>, vector<4x16x1xf32>
      tpu.vector_store %arg10[%c0_7, %c0_8, %c0_9], %11 {strides = array<i32>} : memref<4x16x1xf32, #tpu.memory_space<vmem>>, vector<4x16x1xf32>,
      %cst_10 = arith.constant 0.000000e+00 : f32
      %13 = vector.broadcast %cst_10 : f32 to vector<4x16x1xf32>
      %c0_11 = arith.constant 0 : index
      %c0_12 = arith.constant 0 : index
      %c0_13 = arith.constant 0 : index
      %14 = vector.load %arg11[%c0_11, %c0_12, %c0_13] : memref<4x16x1xf32, #tpu.memory_space<vmem>>, vector<4x16x1xf32>
      tpu.vector_store %arg11[%c0_11, %c0_12, %c0_13], %13 {strides = array<i32>} : memref<4x16x1xf32, #tpu.memory_space<vmem>>, vector<4x16x1xf32>,
      %cst_14 = arith.constant 0.000000e+00 : f32
      %15 = vector.broadcast %cst_14 : f32 to vector<4x16x32xf32>
      %c0_15 = arith.constant 0 : index
      %c0_16 = arith.constant 0 : index
      %c0_17 = arith.constant 0 : index
      %16 = vector.load %arg12[%c0_15, %c0_16, %c0_17] : memref<4x16x32xf32, #tpu.memory_space<vmem>>, vector<4x16x32xf32>
      tpu.vector_store %arg12[%c0_15, %c0_16, %c0_17], %15 {strides = array<i32>} : memref<4x16x32xf32, #tpu.memory_space<vmem>>, vector<4x16x32xf32>,
    } else {
    }
    %c0 = arith.constant 0 : index
    %c0_1 = arith.constant 0 : index
    %c0_2 = arith.constant 0 : index
    %c0_3 = arith.constant 0 : index
    %3 = vector.load %arg4[%c0, %c0_1, %c0_2, %c0_3] : memref<1x4x16x32xbf16, #tpu.memory_space<vmem>>, vector<1x4x16x32xbf16>
    %4 = vector.shape_cast %3 : vector<1x4x16x32xbf16> to vector<4x16x32xbf16>
    %5 = arith.cmpi sle, %arg3, %arg2 : i32
    %6 = arith.extui %5 : i1 to i32
    %c0_i32_4 = arith.constant 0 : i32
    %7 = arith.cmpi ne, %6, %c0_i32_4 : i32
    scf.if %7 {
      %c0_7 = arith.constant 0 : index
      %c0_8 = arith.constant 0 : index
      %c0_9 = arith.constant 0 : index
      %c0_10 = arith.constant 0 : index
      %11 = vector.load %arg5[%c0_7, %c0_8, %c0_9, %c0_10] : memref<1x4x16x32xbf16, #tpu.memory_space<vmem>>, vector<1x4x16x32xbf16>
      %12 = vector.shape_cast %11 : vector<1x4x16x32xbf16> to vector<4x16x32xbf16>
      "tpu.trace_start"() <{level = 10 : i32, message = "hqd,hkd->hqk"}> : () -> ()
      %cst = arith.constant dense<0.000000e+00> : vector<4x16x16xf32>
      %13 = tpu.matmul %4, %12, %cst {dimension_numbers = #tpu.dot_dimension_numbers<[2], [2], [1], [1], [0, 0, 0, 1, 1, 1], [0], [0]>} : vector<4x16x32xbf16>, vector<4x16x32xbf16>, vector<4x16x16xf32> -> vector<4x16x16xf32>
      "tpu.trace_stop"() : () -> ()
      %cst_11 = arith.constant 0.176776692 : f32
      %14 = vector.broadcast %cst_11 : f32 to vector<4x16x16xf32>
      %15 = arith.mulf %13, %14 : vector<4x16x16xf32>
      %c16_i32 = arith.constant 16 : i32
      %16 = arith.muli %arg2, %c16_i32 : i32
      %17 = tpu.iota {dimensions = array<i32: 1>} : vector<1x16x16xi32>
      %18 = vector.broadcast %16 : i32 to vector<1x16x16xi32>
      %19 = arith.addi %18, %17 : vector<1x16x16xi32>
      %c16_i32_12 = arith.constant 16 : i32
      %20 = arith.muli %arg3, %c16_i32_12 : i32
      %21 = tpu.iota {dimensions = array<i32: 2>} : vector<1x16x16xi32>
      %22 = vector.broadcast %20 : i32 to vector<1x16x16xi32>
      %23 = arith.addi %22, %21 : vector<1x16x16xi32>
      %24 = arith.cmpi sge, %19, %23 : vector<1x16x16xi32>
      %cst_13 = arith.constant -1.000000e+30 : f32
      %25 = vector.shape_cast %24 : vector<1x16x16xi1> to vector<1x16x16xi1>
      %26 = vector.broadcast %25 : vector<1x16x16xi1> to vector<4x16x16xi1>
      %27 = vector.broadcast %cst_13 : f32 to vector<4x16x16xf32>
      %28 = arith.select %26, %15, %27 : vector<4x16x16xi1>, vector<4x16x16xf32>
      %c0_14 = arith.constant 0 : index
      %c0_15 = arith.constant 0 : index
      %c0_16 = arith.constant 0 : index
      %29 = vector.load %arg10[%c0_14, %c0_15, %c0_16] : memref<4x16x1xf32, #tpu.memory_space<vmem>>, vector<4x16x1xf32>
      %cst_17 = arith.constant dense<0xFF800000> : vector<4x16xf32>
      %30 = vector.multi_reduction <maximumf>, %28, %cst_17 [2] : vector<4x16x16xf32> to vector<4x16xf32>
      %31 = vector.shape_cast %30 : vector<4x16xf32> to vector<4x16x1xf32>
      %32 = arith.maximumf %29, %31 : vector<4x16x1xf32>
      %33 = arith.subf %29, %32 : vector<4x16x1xf32>
      %34 = math.exp %33 : vector<4x16x1xf32>
      %35 = vector.broadcast %32 : vector<4x16x1xf32> to vector<4x16x16xf32>
      %36 = arith.subf %28, %35 : vector<4x16x16xf32>
      %37 = math.exp %36 : vector<4x16x16xf32>
      %c0_18 = arith.constant 0 : index
      %c0_19 = arith.constant 0 : index
      %c0_20 = arith.constant 0 : index
      %38 = vector.load %arg11[%c0_18, %c0_19, %c0_20] : memref<4x16x1xf32, #tpu.memory_space<vmem>>, vector<4x16x1xf32>
      %39 = arith.mulf %34, %38 : vector<4x16x1xf32>
      %cst_21 = arith.constant dense<0.000000e+00> : vector<4x16xf32>
      %40 = vector.multi_reduction <add>, %37, %cst_21 [2] : vector<4x16x16xf32> to vector<4x16xf32>
      %41 = vector.shape_cast %40 : vector<4x16xf32> to vector<4x16x1xf32>
      %42 = arith.addf %39, %41 : vector<4x16x1xf32>
      %c0_22 = arith.constant 0 : index
      %c0_23 = arith.constant 0 : index
      %c0_24 = arith.constant 0 : index
      %43 = vector.load %arg11[%c0_22, %c0_23, %c0_24] : memref<4x16x1xf32, #tpu.memory_space<vmem>>, vector<4x16x1xf32>
      tpu.vector_store %arg11[%c0_22, %c0_23, %c0_24], %42 {strides = array<i32>} : memref<4x16x1xf32, #tpu.memory_space<vmem>>, vector<4x16x1xf32>,
      %c0_25 = arith.constant 0 : index
      %c0_26 = arith.constant 0 : index
      %c0_27 = arith.constant 0 : index
      %44 = vector.load %arg12[%c0_25, %c0_26, %c0_27] : memref<4x16x32xf32, #tpu.memory_space<vmem>>, vector<4x16x32xf32>
      %45 = vector.broadcast %34 : vector<4x16x1xf32> to vector<4x16x32xf32>
      %46 = arith.mulf %45, %44 : vector<4x16x32xf32>
      %47 = arith.truncf %37 : vector<4x16x16xf32> to vector<4x16x16xbf16>
      %c0_28 = arith.constant 0 : index
      %c0_29 = arith.constant 0 : index
      %c0_30 = arith.constant 0 : index
      %c0_31 = arith.constant 0 : index
      %48 = vector.load %arg6[%c0_28, %c0_29, %c0_30, %c0_31] : memref<1x4x16x32xbf16, #tpu.memory_space<vmem>>, vector<1x4x16x32xbf16>
      %49 = vector.shape_cast %48 : vector<1x4x16x32xbf16> to vector<4x16x32xbf16>
      "tpu.trace_start"() <{level = 10 : i32, message = "hqk,hkd->hqd"}> : () -> ()
      %cst_32 = arith.constant dense<0.000000e+00> : vector<4x16x32xf32>
      %50 = tpu.matmul %47, %49, %cst_32 {dimension_numbers = #tpu.dot_dimension_numbers<[2], [1], [1], [2], [0, 0, 0, 1, 1, 2], [0], [0]>} : vector<4x16x16xbf16>, vector<4x16x32xbf16>, vector<4x16x32xf32> -> vector<4x16x32xf32>
      "tpu.trace_stop"() : () -> ()
      %51 = arith.addf %46, %50 : vector<4x16x32xf32>
      %c0_33 = arith.constant 0 : index
      %c0_34 = arith.constant 0 : index
      %c0_35 = arith.constant 0 : index
      %52 = vector.load %arg12[%c0_33, %c0_34, %c0_35] : memref<4x16x32xf32, #tpu.memory_space<vmem>>, vector<4x16x32xf32>
      tpu.vector_store %arg12[%c0_33, %c0_34, %c0_35], %51 {strides = array<i32>} : memref<4x16x32xf32, #tpu.memory_space<vmem>>, vector<4x16x32xf32>,
      %c0_36 = arith.constant 0 : index
      %c0_37 = arith.constant 0 : index
      %c0_38 = arith.constant 0 : index
      %53 = vector.load %arg10[%c0_36, %c0_37, %c0_38] : memref<4x16x1xf32, #tpu.memory_space<vmem>>, vector<4x16x1xf32>
      tpu.vector_store %arg10[%c0_36, %c0_37, %c0_38], %32 {strides = array<i32>} : memref<4x16x1xf32, #tpu.memory_space<vmem>>, vector<4x16x1xf32>,
    } else {
    }
    %c0_i32_5 = arith.constant 0 : i32
    %8 = arith.cmpi eq, %arg3, %c0_i32_5 : i32
    %9 = arith.extui %8 : i1 to i32
    %c0_i32_6 = arith.constant 0 : i32
    %10 = arith.cmpi ne, %9, %c0_i32_6 : i32
    scf.if %10 {
      %c0_7 = arith.constant 0 : index
      %c0_8 = arith.constant 0 : index
      %c0_9 = arith.constant 0 : index
      %11 = vector.load %arg7[%c0_7, %c0_8, %c0_9] : memref<4x10x32xbf16, #tpu.memory_space<vmem>>, vector<4x10x32xbf16>
      %c0_10 = arith.constant 0 : index
      %c0_11 = arith.constant 0 : index
      %c0_12 = arith.constant 0 : index
      %12 = vector.load %arg8[%c0_10, %c0_11, %c0_12] : memref<4x10x32xbf16, #tpu.memory_space<vmem>>, vector<4x10x32xbf16>
      "tpu.trace_start"() <{level = 10 : i32, message = "hqd,hkd->hqk"}> : () -> ()
      %cst = arith.constant dense<0.000000e+00> : vector<4x16x10xf32>
      %13 = tpu.matmul %4, %11, %cst {dimension_numbers = #tpu.dot_dimension_numbers<[2], [2], [1], [1], [0, 0, 0, 1, 1, 1], [0], [0]>} : vector<4x16x32xbf16>, vector<4x10x32xbf16>, vector<4x16x10xf32> -> vector<4x16x10xf32>
      "tpu.trace_stop"() : () -> ()
      %cst_13 = arith.constant 0.176776692 : f32
      %14 = vector.broadcast %cst_13 : f32 to vector<4x16x10xf32>
      %15 = arith.mulf %13, %14 : vector<4x16x10xf32>
      %cst_14 = arith.constant dense<0xFF800000> : vector<4x16xf32>
      %16 = vector.multi_reduction <maximumf>, %15, %cst_14 [2] : vector<4x16x10xf32> to vector<4x16xf32>
      %17 = vector.shape_cast %16 : vector<4x16xf32> to vector<4x16x1xf32>
      %18 = vector.broadcast %17 : vector<4x16x1xf32> to vector<4x16x10xf32>
      %19 = arith.subf %15, %18 : vector<4x16x10xf32>
      %20 = math.exp %19 : vector<4x16x10xf32>
      %cst_15 = arith.constant dense<0.000000e+00> : vector<4x16xf32>
      %21 = vector.multi_reduction <add>, %20, %cst_15 [2] : vector<4x16x10xf32> to vector<4x16xf32>
      %22 = vector.shape_cast %21 : vector<4x16xf32> to vector<4x16x1xf32>
      %23 = tpu.reciprocal %22 {approx = true} : vector<4x16x1xf32> -> vector<4x16x1xf32>
      %24 = vector.broadcast %23 : vector<4x16x1xf32> to vector<4x16x10xf32>
      %25 = arith.mulf %20, %24 : vector<4x16x10xf32>
      %26 = arith.truncf %25 : vector<4x16x10xf32> to vector<4x16x10xbf16>
      "tpu.trace_start"() <{level = 10 : i32, message = "hqk,hkd->hqd"}> : () -> ()
      %cst_16 = arith.constant dense<0.000000e+00> : vector<4x16x32xf32>
      %27 = tpu.matmul %26, %12, %cst_16 {dimension_numbers = #tpu.dot_dimension_numbers<[2], [1], [1], [2], [0, 0, 0, 1, 1, 2], [0], [0]>} : vector<4x16x10xbf16>, vector<4x10x32xbf16>, vector<4x16x32xf32> -> vector<4x16x32xf32>
      "tpu.trace_stop"() : () -> ()
      %c0_17 = arith.constant 0 : index
      %c0_18 = arith.constant 0 : index
      %c0_19 = arith.constant 0 : index
      %28 = vector.load %arg12[%c0_17, %c0_18, %c0_19] : memref<4x16x32xf32, #tpu.memory_space<vmem>>, vector<4x16x32xf32>
      %c0_20 = arith.constant 0 : index
      %c0_21 = arith.constant 0 : index
      %c0_22 = arith.constant 0 : index
      %29 = vector.load %arg11[%c0_20, %c0_21, %c0_22] : memref<4x16x1xf32, #tpu.memory_space<vmem>>, vector<4x16x1xf32>
      %30 = tpu.reciprocal %29 {approx = true} : vector<4x16x1xf32> -> vector<4x16x1xf32>
      %31 = vector.broadcast %30 : vector<4x16x1xf32> to vector<4x16x32xf32>
      %32 = arith.mulf %28, %31 : vector<4x16x32xf32>
      %33 = arith.addf %32, %27 : vector<4x16x32xf32>
      %34 = arith.truncf %33 : vector<4x16x32xf32> to vector<4x16x32xbf16>
      %c0_23 = arith.constant 0 : index
      %c0_24 = arith.constant 0 : index
      %c0_25 = arith.constant 0 : index
      %c0_26 = arith.constant 0 : index
      %35 = vector.load %arg9[%c0_23, %c0_24, %c0_25, %c0_26] : memref<1x4x16x32xbf16, #tpu.memory_space<vmem>>, vector<1x4x16x32xbf16>
      %36 = vector.shape_cast %35 : vector<1x4x16x32xbf16> to vector<4x16x32xbf16>
      %37 = vector.shape_cast %34 : vector<4x16x32xbf16> to vector<1x4x16x32xbf16>
      tpu.vector_store %arg9[%c0_23, %c0_24, %c0_25, %c0_26], %37 {strides = array<i32>} : memref<1x4x16x32xbf16, #tpu.memory_space<vmem>>, vector<1x4x16x32xbf16>,
    } else {
    }
    return
  }
  func.func @transform_0(%arg0: i32, %arg1: i32, %arg2: i32, %arg3: i32) -> (i32, i32, i32, i32) {
    %c0_i32 = arith.constant 0 : i32
    %c0_i32_0 = arith.constant 0 : i32
    return %arg0, %arg1, %arg2, %c0_i32 : i32, i32, i32, i32
  }
  func.func @transform_1(%arg0: i32, %arg1: i32, %arg2: i32, %arg3: i32) -> (i32, i32, i32, i32) {
    %0 = arith.minsi %arg3, %arg2 : i32
    %c0_i32 = arith.constant 0 : i32
    %c0_i32_0 = arith.constant 0 : i32
    return %arg0, %arg1, %0, %c0_i32 : i32, i32, i32, i32
  }
  func.func @transform_2(%arg0: i32, %arg1: i32, %arg2: i32, %arg3: i32) -> (i32, i32, i32, i32) {
    %0 = arith.minsi %arg3, %arg2 : i32
    %c0_i32 = arith.constant 0 : i32
    %c0_i32_0 = arith.constant 0 : i32
    return %arg0, %arg1, %0, %c0_i32 : i32, i32, i32, i32
  }
  func.func @transform_3(%arg0: i32, %arg1: i32, %arg2: i32, %arg3: i32) -> (i32, i32, i32) {
    %c0_i32 = arith.constant 0 : i32
    %c0_i32_0 = arith.constant 0 : i32
    %c0_i32_1 = arith.constant 0 : i32
    return %arg1, %c0_i32, %c0_i32_0 : i32, i32, i32
  }
  func.func @transform_4(%arg0: i32, %arg1: i32, %arg2: i32, %arg3: i32) -> (i32, i32, i32) {
    %c0_i32 = arith.constant 0 : i32
    %c0_i32_0 = arith.constant 0 : i32
    %c0_i32_1 = arith.constant 0 : i32
    return %arg1, %c0_i32, %c0_i32_0 : i32, i32, i32
  }
  func.func @transform_5(%arg0: i32, %arg1: i32, %arg2: i32, %arg3: i32) -> (i32, i32, i32, i32) {
    %c0_i32 = arith.constant 0 : i32
    %c0_i32_0 = arith.constant 0 : i32
    return %arg0, %arg1, %arg2, %c0_i32 : i32, i32, i32, i32
  }
}

module attributes {stable_mosaic.version = 11 : i64} {
  func.func @_matmul_residual_kernel(%arg0: i32, %arg1: i32, %arg2: i32, %arg3: memref<32x128xbf16, #tpu.memory_space<vmem>>, %arg4: memref<128x128xbf16, #tpu.memory_space<vmem>>, %arg5: memref<32x128xf32, #tpu.memory_space<vmem>>, %arg6: memref<32x128xf32, #tpu.memory_space<vmem>>, %arg7: memref<32x128xf32, #tpu.memory_space<vmem>>) attributes {dimension_semantics = [#tpu.dimension_semantics<parallel>, #tpu.dimension_semantics<parallel>, #tpu.dimension_semantics<arbitrary>], iteration_bounds = array<i64: 1, 1, 1>, scalar_prefetch = 0 : i64, scratch_operands = 1 : i64, tpu.core_type = #tpu.core_type<tc>, window_params = [{transform_indices = @transform_0, window_bounds = array<i64: 32, 128>}, {transform_indices = @transform_1, window_bounds = array<i64: 128, 128>}, {transform_indices = @transform_2, window_bounds = array<i64: 32, 128>}, {transform_indices = @transform_3, window_bounds = array<i64: 32, 128>}]} {
    %c0_i32 = arith.constant 0 : i32
    %0 = arith.cmpi eq, %arg2, %c0_i32 : i32
    %1 = arith.extui %0 : i1 to i32
    %c0_i32_0 = arith.constant 0 : i32
    %2 = arith.cmpi ne, %1, %c0_i32_0 : i32
    scf.if %2 {
      %cst_10 = arith.constant 0.000000e+00 : f32
      %12 = vector.broadcast %cst_10 : f32 to vector<32x128xf32>
      %c0_11 = arith.constant 0 : index
      %c0_12 = arith.constant 0 : index
      %13 = vector.load %arg7[%c0_11, %c0_12] : memref<32x128xf32, #tpu.memory_space<vmem>>, vector<32x128xf32>
      tpu.vector_store %arg7[%c0_11, %c0_12], %12 {strides = array<i32>} : memref<32x128xf32, #tpu.memory_space<vmem>>, vector<32x128xf32>,
    } else {
    }
    %c0 = arith.constant 0 : index
    %c0_1 = arith.constant 0 : index
    %3 = vector.load %arg7[%c0, %c0_1] : memref<32x128xf32, #tpu.memory_space<vmem>>, vector<32x128xf32>
    %c0_2 = arith.constant 0 : index
    %c0_3 = arith.constant 0 : index
    %4 = vector.load %arg3[%c0_2, %c0_3] : memref<32x128xbf16, #tpu.memory_space<vmem>>, vector<32x128xbf16>
    %c0_4 = arith.constant 0 : index
    %c0_5 = arith.constant 0 : index
    %5 = vector.load %arg4[%c0_4, %c0_5] : memref<128x128xbf16, #tpu.memory_space<vmem>>, vector<128x128xbf16>
    %cst = arith.constant dense<0.000000e+00> : vector<32x128xf32>
    %6 = tpu.matmul %4, %5, %cst {dimension_numbers = #tpu.dot_dimension_numbers<[1], [0], [0], [1], [0, 0, 1, 1], [], []>} : vector<32x128xbf16>, vector<128x128xbf16>, vector<32x128xf32> -> vector<32x128xf32>
    %7 = arith.addf %3, %6 : vector<32x128xf32>
    %c0_6 = arith.constant 0 : index
    %c0_7 = arith.constant 0 : index
    %8 = vector.load %arg7[%c0_6, %c0_7] : memref<32x128xf32, #tpu.memory_space<vmem>>, vector<32x128xf32>
    tpu.vector_store %arg7[%c0_6, %c0_7], %7 {strides = array<i32>} : memref<32x128xf32, #tpu.memory_space<vmem>>, vector<32x128xf32>,
    %c0_i32_8 = arith.constant 0 : i32
    %9 = arith.cmpi eq, %arg2, %c0_i32_8 : i32
    %10 = arith.extui %9 : i1 to i32
    %c0_i32_9 = arith.constant 0 : i32
    %11 = arith.cmpi ne, %10, %c0_i32_9 : i32
    scf.if %11 {
      %c0_10 = arith.constant 0 : index
      %c0_11 = arith.constant 0 : index
      %12 = vector.load %arg5[%c0_10, %c0_11] : memref<32x128xf32, #tpu.memory_space<vmem>>, vector<32x128xf32>
      %c0_12 = arith.constant 0 : index
      %c0_13 = arith.constant 0 : index
      %13 = vector.load %arg7[%c0_12, %c0_13] : memref<32x128xf32, #tpu.memory_space<vmem>>, vector<32x128xf32>
      %14 = arith.addf %12, %13 : vector<32x128xf32>
      %c0_14 = arith.constant 0 : index
      %c0_15 = arith.constant 0 : index
      %15 = vector.load %arg6[%c0_14, %c0_15] : memref<32x128xf32, #tpu.memory_space<vmem>>, vector<32x128xf32>
      tpu.vector_store %arg6[%c0_14, %c0_15], %14 {strides = array<i32>} : memref<32x128xf32, #tpu.memory_space<vmem>>, vector<32x128xf32>,
    } else {
    }
    return
  }
  func.func @transform_0(%arg0: i32, %arg1: i32, %arg2: i32) -> (i32, i32) {
    %c0_i32 = arith.constant 0 : i32
    return %arg0, %arg2 : i32, i32
  }
  func.func @transform_1(%arg0: i32, %arg1: i32, %arg2: i32) -> (i32, i32) {
    %c0_i32 = arith.constant 0 : i32
    return %arg2, %arg1 : i32, i32
  }
  func.func @transform_2(%arg0: i32, %arg1: i32, %arg2: i32) -> (i32, i32) {
    %c0_i32 = arith.constant 0 : i32
    return %arg0, %arg1 : i32, i32
  }
  func.func @transform_3(%arg0: i32, %arg1: i32, %arg2: i32) -> (i32, i32) {
    %c0_i32 = arith.constant 0 : i32
    return %arg0, %arg1 : i32, i32
  }
}

module attributes {stable_mosaic.version = 11 : i64} {
  func.func @_rmsnorm_mlp_residual_kernel(%arg0: i32, %arg1: i32, %arg2: memref<32x128xf32, #tpu.memory_space<vmem>>, %arg3: memref<1x128xf32, #tpu.memory_space<vmem>>, %arg4: memref<128x512xbf16, #tpu.memory_space<vmem>>, %arg5: memref<128x512xbf16, #tpu.memory_space<vmem>>, %arg6: memref<512x128xbf16, #tpu.memory_space<vmem>>, %arg7: memref<32x128xf32, #tpu.memory_space<vmem>>, %arg8: memref<32x128xf32, #tpu.memory_space<vmem>>, %arg9: memref<32x128xbf16, #tpu.memory_space<vmem>>) attributes {dimension_semantics = [#tpu.dimension_semantics<parallel>, #tpu.dimension_semantics<arbitrary>], iteration_bounds = array<i64: 1, 1>, scalar_prefetch = 0 : i64, scratch_operands = 2 : i64, tpu.core_type = #tpu.core_type<tc>, window_params = [{transform_indices = @transform_0, window_bounds = array<i64: 32, 128>}, {pipeline_mode = #tpu.pipeline_mode<synchronous>, transform_indices = @transform_1, window_bounds = array<i64: 1, 128>}, {transform_indices = @transform_2, window_bounds = array<i64: 128, 512>}, {transform_indices = @transform_3, window_bounds = array<i64: 128, 512>}, {transform_indices = @transform_4, window_bounds = array<i64: 512, 128>}, {transform_indices = @transform_5, window_bounds = array<i64: 32, 128>}]} {
    %c0_i32 = arith.constant 0 : i32
    %0 = arith.cmpi eq, %arg1, %c0_i32 : i32
    %1 = arith.extui %0 : i1 to i32
    %c0_i32_0 = arith.constant 0 : i32
    %2 = arith.cmpi ne, %1, %c0_i32_0 : i32
    scf.if %2 {
      %cst_18 = arith.constant 0.000000e+00 : f32
      %25 = vector.broadcast %cst_18 : f32 to vector<32x128xf32>
      %c0_19 = arith.constant 0 : index
      %c0_20 = arith.constant 0 : index
      %26 = vector.load %arg8[%c0_19, %c0_20] : memref<32x128xf32, #tpu.memory_space<vmem>>, vector<32x128xf32>
      tpu.vector_store %arg8[%c0_19, %c0_20], %25 {strides = array<i32>} : memref<32x128xf32, #tpu.memory_space<vmem>>, vector<32x128xf32>,
      %c0_21 = arith.constant 0 : index
      %c0_22 = arith.constant 0 : index
      %27 = vector.load %arg2[%c0_21, %c0_22] : memref<32x128xf32, #tpu.memory_space<vmem>>, vector<32x128xf32>
      %28 = arith.mulf %27, %27 : vector<32x128xf32>
      %cst_23 = arith.constant dense<0.000000e+00> : vector<32xf32>
      %29 = vector.multi_reduction <add>, %28, %cst_23 [1] : vector<32x128xf32> to vector<32xf32>
      %30 = vector.shape_cast %29 : vector<32xf32> to vector<32x1xf32>
      %cst_24 = arith.constant 1.280000e+02 : f32
      %31 = vector.broadcast %cst_24 : f32 to vector<32x1xf32>
      %32 = arith.divf %30, %31 : vector<32x1xf32>
      %cst_25 = arith.constant 9.99999974E-6 : f32
      %33 = vector.broadcast %cst_25 : f32 to vector<32x1xf32>
      %34 = arith.addf %32, %33 : vector<32x1xf32>
      %35 = math.rsqrt %34 : vector<32x1xf32>
      %36 = vector.broadcast %35 : vector<32x1xf32> to vector<32x128xf32>
      %37 = arith.mulf %27, %36 : vector<32x128xf32>
      %c0_26 = arith.constant 0 : index
      %c0_27 = arith.constant 0 : index
      %38 = vector.load %arg3[%c0_26, %c0_27] : memref<1x128xf32, #tpu.memory_space<vmem>>, vector<1x128xf32>
      %39 = vector.broadcast %38 : vector<1x128xf32> to vector<32x128xf32>
      %40 = arith.mulf %37, %39 : vector<32x128xf32>
      %41 = arith.truncf %40 : vector<32x128xf32> to vector<32x128xbf16>
      %c0_28 = arith.constant 0 : index
      %c0_29 = arith.constant 0 : index
      %42 = vector.load %arg9[%c0_28, %c0_29] : memref<32x128xbf16, #tpu.memory_space<vmem>>, vector<32x128xbf16>
      tpu.vector_store %arg9[%c0_28, %c0_29], %41 {strides = array<i32>} : memref<32x128xbf16, #tpu.memory_space<vmem>>, vector<32x128xbf16>,
    } else {
    }
    %c0 = arith.constant 0 : index
    %c0_1 = arith.constant 0 : index
    %3 = vector.load %arg9[%c0, %c0_1] : memref<32x128xbf16, #tpu.memory_space<vmem>>, vector<32x128xbf16>
    %c0_2 = arith.constant 0 : index
    %c0_3 = arith.constant 0 : index
    %4 = vector.load %arg4[%c0_2, %c0_3] : memref<128x512xbf16, #tpu.memory_space<vmem>>, vector<128x512xbf16>
    %cst = arith.constant dense<0.000000e+00> : vector<32x512xf32>
    %5 = tpu.matmul %3, %4, %cst {dimension_numbers = #tpu.dot_dimension_numbers<[1], [0], [0], [1], [0, 0, 1, 1], [], []>} : vector<32x128xbf16>, vector<128x512xbf16>, vector<32x512xf32> -> vector<32x512xf32>
    %c0_4 = arith.constant 0 : index
    %c0_5 = arith.constant 0 : index
    %6 = vector.load %arg5[%c0_4, %c0_5] : memref<128x512xbf16, #tpu.memory_space<vmem>>, vector<128x512xbf16>
    %cst_6 = arith.constant dense<0.000000e+00> : vector<32x512xf32>
    %7 = tpu.matmul %3, %6, %cst_6 {dimension_numbers = #tpu.dot_dimension_numbers<[1], [0], [0], [1], [0, 0, 1, 1], [], []>} : vector<32x128xbf16>, vector<128x512xbf16>, vector<32x512xf32> -> vector<32x512xf32>
    %cst_7 = arith.constant 0.000000e+00 : f32
    %8 = vector.broadcast %cst_7 : f32 to vector<32x512xf32>
    %9 = arith.subf %8, %5 : vector<32x512xf32>
    %10 = math.exp %9 : vector<32x512xf32>
    %cst_8 = arith.constant 1.000000e+00 : f32
    %11 = vector.broadcast %cst_8 : f32 to vector<32x512xf32>
    %12 = arith.addf %11, %10 : vector<32x512xf32>
    %13 = tpu.reciprocal %12 {approx = true} : vector<32x512xf32> -> vector<32x512xf32>
    %14 = arith.mulf %5, %13 : vector<32x512xf32>
    %15 = arith.mulf %14, %7 : vector<32x512xf32>
    %16 = arith.truncf %15 : vector<32x512xf32> to vector<32x512xbf16>
    %c0_9 = arith.constant 0 : index
    %c0_10 = arith.constant 0 : index
    %17 = vector.load %arg8[%c0_9, %c0_10] : memref<32x128xf32, #tpu.memory_space<vmem>>, vector<32x128xf32>
    %c0_11 = arith.constant 0 : index
    %c0_12 = arith.constant 0 : index
    %18 = vector.load %arg6[%c0_11, %c0_12] : memref<512x128xbf16, #tpu.memory_space<vmem>>, vector<512x128xbf16>
    %cst_13 = arith.constant dense<0.000000e+00> : vector<32x128xf32>
    %19 = tpu.matmul %16, %18, %cst_13 {dimension_numbers = #tpu.dot_dimension_numbers<[1], [0], [0], [1], [0, 0, 1, 1], [], []>} : vector<32x512xbf16>, vector<512x128xbf16>, vector<32x128xf32> -> vector<32x128xf32>
    %20 = arith.addf %17, %19 : vector<32x128xf32>
    %c0_14 = arith.constant 0 : index
    %c0_15 = arith.constant 0 : index
    %21 = vector.load %arg8[%c0_14, %c0_15] : memref<32x128xf32, #tpu.memory_space<vmem>>, vector<32x128xf32>
    tpu.vector_store %arg8[%c0_14, %c0_15], %20 {strides = array<i32>} : memref<32x128xf32, #tpu.memory_space<vmem>>, vector<32x128xf32>,
    %c0_i32_16 = arith.constant 0 : i32
    %22 = arith.cmpi eq, %arg1, %c0_i32_16 : i32
    %23 = arith.extui %22 : i1 to i32
    %c0_i32_17 = arith.constant 0 : i32
    %24 = arith.cmpi ne, %23, %c0_i32_17 : i32
    scf.if %24 {
      %c0_18 = arith.constant 0 : index
      %c0_19 = arith.constant 0 : index
      %25 = vector.load %arg2[%c0_18, %c0_19] : memref<32x128xf32, #tpu.memory_space<vmem>>, vector<32x128xf32>
      %c0_20 = arith.constant 0 : index
      %c0_21 = arith.constant 0 : index
      %26 = vector.load %arg8[%c0_20, %c0_21] : memref<32x128xf32, #tpu.memory_space<vmem>>, vector<32x128xf32>
      %27 = arith.addf %25, %26 : vector<32x128xf32>
      %c0_22 = arith.constant 0 : index
      %c0_23 = arith.constant 0 : index
      %28 = vector.load %arg7[%c0_22, %c0_23] : memref<32x128xf32, #tpu.memory_space<vmem>>, vector<32x128xf32>
      tpu.vector_store %arg7[%c0_22, %c0_23], %27 {strides = array<i32>} : memref<32x128xf32, #tpu.memory_space<vmem>>, vector<32x128xf32>,
    } else {
    }
    return
  }
  func.func @transform_0(%arg0: i32, %arg1: i32) -> (i32, i32) {
    %c0_i32 = arith.constant 0 : i32
    %c0_i32_0 = arith.constant 0 : i32
    return %arg0, %c0_i32 : i32, i32
  }
  func.func @transform_1(%arg0: i32, %arg1: i32) -> (i32, i32) {
    %c0_i32 = arith.constant 0 : i32
    %c0_i32_0 = arith.constant 0 : i32
    %c0_i32_1 = arith.constant 0 : i32
    return %c0_i32, %c0_i32_0 : i32, i32
  }
  func.func @transform_2(%arg0: i32, %arg1: i32) -> (i32, i32) {
    %c0_i32 = arith.constant 0 : i32
    %c0_i32_0 = arith.constant 0 : i32
    return %c0_i32, %arg1 : i32, i32
  }
  func.func @transform_3(%arg0: i32, %arg1: i32) -> (i32, i32) {
    %c0_i32 = arith.constant 0 : i32
    %c0_i32_0 = arith.constant 0 : i32
    return %c0_i32, %arg1 : i32, i32
  }
  func.func @transform_4(%arg0: i32, %arg1: i32) -> (i32, i32) {
    %c0_i32 = arith.constant 0 : i32
    %c0_i32_0 = arith.constant 0 : i32
    return %arg1, %c0_i32 : i32, i32
  }
  func.func @transform_5(%arg0: i32, %arg1: i32) -> (i32, i32) {
    %c0_i32 = arith.constant 0 : i32
    %c0_i32_0 = arith.constant 0 : i32
    return %arg0, %c0_i32 : i32, i32
  }
}

</mosaic_0001>

<bundles_post_ra>
// kernel: block_forward.4
= control target key start
LH: loop header
LB: loop body
LE: loop exit
PB: predicated region body
PF: predicated region fallthrough
CT: control target
= control target key end

     0   :  { %8 = vsyncpa [#allocation3], 0  ;;  %s529_s12 = smov [#allocation2]   ;;  %s624_s0 = inlined_call_operand.vmem [shape: f32[32,128], index: 0, kind: input, shape index: {}]   ;;  %s625_s1 = inlined_call_operand.vmem [shape: f32[1,128], index: 1, kind: input, shape index: {}]   ;;  %s626_s2 = inlined_call_operand.hbm [shape: bf16[128,384], index: 2, kind: input, shape index: {}]   ;;  %s627_s3 = inlined_call_operand.vmem [shape: bf16[32,384], index: 3, kind: output, shape index: {}]  }
   0x1   :  { %s18_s13 = sshll.u32 %s529_s12, 4  ;;  %s505_s16 = scalar_lea.hbm %s626_s2, 3072  ;;  %s19_s13 = int_to_ptr.vmem [resolvable:$true] %s18_s13 }
   0x2   :  { %p506_p0 = scmp.ne.s32.totalorder %s626_s2, %s505_s16  ;;  %p509_p1 = scmp.lt.u32.totalorder %s505_s16, %s626_s2 }
   0x4   :  { %p511_p2 = pnand %p509_p1, %p506_p0 }
   0x6   :  { %514 = shalt.err (!%p511_p2)
}
   0x7   :  { %s515_s21 = scalar_lea.vmem %s19_s13, 3072  ;;  %p520_p4 = scmp.lt.s32.totalorder %s19_s13, %s19_s13 }
   0x8   :  { %p516_p3 = scmp.ne.s32.totalorder %s19_s13, %s515_s21  ;;  %p521_p5 = scmp.lt.s32.totalorder %s515_s21, %s515_s21 }
   0xa   :  { %p522_p6 = por %p521_p5, %p520_p4 }
   0xc   :  { %p523_p7 = pnand %p522_p6, %p516_p3 }
   0xe   :  { %526 = shalt.err (!%p523_p7)
}
   0xf   :  { %s530_s22 = smov 192   ;;  %s531_s23 = smov 12  }
  0x10   :  { %24 = dma.hbm_to_vmem [thread:$0]  %s626_s2, 3072, %s19_s13, [#allocation3], %s530_s22, %s530_s22, %s531_s23  }
  0x11   :  { %527 = dma.done.wait [#allocation3], 3072  }
  0x12   :  { %528 = vsyncadd [#allocation3], 4294964224  ;;  %v568_v0 = vld [vmem:[%s624_s0] sm:$0xff]  ;;  %v573_v1 = vld [vmem:[%s624_s0 + $0x10] sm:$0xff]  ;;  %v532_v28 = vmov 0  }
  0x13   :  { %v578_v2 = vld [vmem:[%s624_s0 + $0x8] sm:$0xff]  ;;  %v33_v3 = vmul.f32 %v568_v0, %v568_v0  ;;  %v35_v4 = vmul.f32 %v573_v1, %v573_v1  ;;  %v587_v5 = vld [vmem:[%s624_s0 + $0x18] sm:$0xff]  ;;  %v465_v6 = vld [vmem:[#allocation2 + $0x4] ss:$12 sps:$4 sm:$0xff]   ;;  %267 = vmatprep.mubr.bf16.mxu0 %v532_v28 }
  0x14   :  { %v467_v7 = vld [vmem:[#allocation2] ss:$12 sps:$4 sm:$0xff]   ;;  %v34_v8 = vmul.f32 %v578_v2, %v578_v2  ;;  %v36_v9 = vmul.f32 %v587_v5, %v587_v5  ;;  %v468_v10 = vld [vmem:[#allocation2 + $0x8] ss:$12 sps:$4 sm:$0xff]   ;;  %235 = vmatprep.subr.bf16.mxu0 %v465_v6  ;;  %v471_v12 = vld [vmem:[#allocation2 + $0x18] ss:$12 sps:$4 sm:$0xff]  }
  0x15   :  { %37 = vadd.xlane.f32.xlu0 %v33_v3  ;;  %41 = vadd.xlane.f32.xlu1 %v35_v4  ;;  %v469_v11 = vld [vmem:[#allocation2 + $0x1c] ss:$12 sps:$4 sm:$0xff]   ;;  %v472_v13 = vld [vmem:[#allocation2 + $0x20] ss:$12 sps:$4 sm:$0xff]   ;;  %v476_v16 = vld [vmem:[#allocation2 + $0x38] ss:$12 sps:$4 sm:$0xff]  }
  0x16   :  { %236 = vmatpush1.bf16.msra.mxu0 %v467_v7  ;;  %441 = vmatprep.subr.bf16.mxu1 %v468_v10  ;;  %v473_v14 = vld [vmem:[#allocation2 + $0x34] ss:$12 sps:$4 sm:$0xff]   ;;  %v475_v15 = vld [vmem:[#allocation2 + $0x30] ss:$12 sps:$4 sm:$0xff]   ;;  %v477_v17 = vld [vmem:[#allocation2 + $0x4c] ss:$12 sps:$4 sm:$0xff]  }
  0x17   :  { %442 = vmatpush3.bf16.msra.mxu1 %v468_v10  ;;  %237 = vmatprep.subr.bf16.mxu0 %v469_v11  ;;  %v479_v18 = vld [vmem:[#allocation2 + $0x48] ss:$12 sps:$4 sm:$0xff]   ;;  %v480_v19 = vld [vmem:[#allocation2 + $0x50] ss:$12 sps:$4 sm:$0xff]   ;;  %v483_v21 = vld [vmem:[#allocation2 + $0x60] ss:$12 sps:$4 sm:$0xff]  }
  0x18   :  { %443 = vmatprep.subr.bf16.mxu1 %v472_v13  ;;  %v481_v20 = vld [vmem:[#allocation2 + $0x64] ss:$12 sps:$4 sm:$0xff]   ;;  %v484_v22 = vld [vmem:[#allocation2 + $0x68] ss:$12 sps:$4 sm:$0xff]   ;;  %v488_v24 = vld [vmem:[#allocation2 + $0x80] ss:$12 sps:$4 sm:$0xff]  }
  0x19   :  { %39 = vadd.xlane.f32.xlu0 %v34_v8  ;;  %43 = vadd.xlane.f32.xlu1 %v36_v9  ;;  %v485_v23 = vld [vmem:[#allocation2 + $0x7c] ss:$12 sps:$4 sm:$0xff]   ;;  %v487_v25 = vld [vmem:[#allocation2 + $0x78] ss:$12 sps:$4 sm:$0xff]   ;;  %v489_v26 = vld [vmem:[#allocation2 + $0x94] ss:$12 sps:$4 sm:$0xff]  }
  0x1a   :  { %238 = vmatpush1.bf16.msra.mxu0 %v471_v12  ;;  %v492_v27 = vld [vmem:[#allocation2 + $0x98] ss:$12 sps:$4 sm:$0xff]   ;;  %v491_v29 = vld [vmem:[#allocation2 + $0x90] ss:$12 sps:$4 sm:$0xff]   ;;  %v495_v32 = vld [vmem:[#allocation2 + $0xa8] ss:$12 sps:$4 sm:$0xff]  }
  0x1b   :  { %444 = vmatpush3.bf16.msra.mxu1 %v472_v13  ;;  %239 = vmatprep.subr.bf16.mxu0 %v473_v14  ;;  %v493_v30 = vld [vmem:[#allocation2 + $0xac] ss:$12 sps:$4 sm:$0xff]   ;;  %v496_v31 = vld [vmem:[#allocation2 + $0xb0] ss:$12 sps:$4 sm:$0xff]   ;;  %v390_v50 = vld [vmem:[%s625_s1] ss:$0 sm:$0xff] }
  0x1c   :  { %445 = vmatprep.subr.bf16.mxu1 %v476_v16 }
  0x1e   :  { %240 = vmatpush1.bf16.msra.mxu0 %v475_v15 }
  0x1f   :  { %446 = vmatpush3.bf16.msra.mxu1 %v476_v16  ;;  %241 = vmatprep.subr.bf16.mxu0 %v477_v17 }
  0x20   :  { %447 = vmatprep.subr.bf16.mxu1 %v480_v19 }
  0x22   :  { %242 = vmatpush1.bf16.msra.mxu0 %v479_v18 }
  0x23   :  { %448 = vmatpush3.bf16.msra.mxu1 %v480_v19  ;;  %243 = vmatprep.subr.bf16.mxu0 %v481_v20 }
  0x24   :  { %449 = vmatprep.subr.bf16.mxu1 %v484_v22 }
  0x26   :  { %244 = vmatpush1.bf16.msra.mxu0 %v483_v21 }
  0x27   :  { %450 = vmatpush3.bf16.msra.mxu1 %v484_v22  ;;  %245 = vmatprep.subr.bf16.mxu0 %v485_v23 }
  0x28   :  { %451 = vmatprep.subr.bf16.mxu1 %v488_v24 }
  0x2a   :  { %246 = vmatpush1.bf16.msra.mxu0 %v487_v25 }
  0x2b   :  { %452 = vmatpush3.bf16.msra.mxu1 %v488_v24  ;;  %247 = vmatprep.subr.bf16.mxu0 %v489_v26 }
  0x2c   :  { %453 = vmatprep.subr.bf16.mxu1 %v492_v27 }
  0x2e   :  { %248 = vmatpush1.bf16.msra.mxu0 %v491_v29 }
  0x2f   :  { %454 = vmatpush3.bf16.msra.mxu1 %v492_v27  ;;  %249 = vmatprep.subr.bf16.mxu0 %v493_v30 }
  0x30   :  { %455 = vmatprep.subr.bf16.mxu1 %v496_v31 }
  0x32   :  { %250 = vmatpush1.bf16.msra.mxu0 %v495_v32 }
  0x33   :  { %456 = vmatpush3.bf16.msra.mxu1 %v496_v31 }
  0xa2   :  { %v38_v33 = vpop.xlane.xlu0 %37  ;;  %v42_v34 = vpop.xlane.xlu1 %41 }
  0xa3   :  { %v46_v35 = vmul.f32 0.0078125, %v38_v33  ;;  %v48_v36 = vmul.f32 0.0078125, %v42_v34 }
  0xa5   :  { %v50_v37 = vadd.f32 1e-05, %v46_v35  ;;  %v52_v38 = vadd.f32 1e-05, %v48_v36 }
  0xa6   :  { %v40_v39 = vpop.xlane.xlu0 %39  ;;  %v44_v40 = vpop.xlane.xlu1 %43 }
  0xa7   :  { %497 = vrsqrt.f32 %v50_v37  ;;  %v47_v41 = vmul.f32 0.0078125, %v40_v39  ;;  %v49_v42 = vmul.f32 0.0078125, %v44_v40 }
  0xa8   :  { %499 = vrsqrt.f32 %v52_v38 }
  0xa9   :  { %v51_v43 = vadd.f32 1e-05, %v47_v41  ;;  %v53_v44 = vadd.f32 1e-05, %v49_v42 }
  0xab   :  { %501 = vrsqrt.f32 %v51_v43 }
  0xac   :  { %503 = vrsqrt.f32 %v53_v44 }
  0xb1   :  { %v498_v45 = vpop.eup %497 }
  0xb2   :  { %v500_v46 = vpop.eup %499  ;;  %v58_v48 = vmul.f32 %v498_v45, %v568_v0 }
  0xb3   :  { %v60_v47 = vmul.f32 %v500_v46, %v573_v1 }
  0xb4   :  { %v69_v55 = vmul.f32 %v390_v50, %v58_v48 }
  0xb5   :  { %v502_v49 = vpop.eup %501  ;;  %v71_v54 = vmul.f32 %v390_v50, %v60_v47 }
  0xb6   :  { %v504_v51 = vpop.eup %503  ;;  %v59_v52 = vmul.f32 %v502_v49, %v578_v2 }
  0xb7   :  { %v61_v53 = vmul.f32 %v504_v51, %v587_v5 }
  0xb8   :  { %v70_v56 = vmul.f32 %v390_v50, %v59_v52 }
  0xb9   :  { %v72_v57 = vmul.f32 %v390_v50, %v61_v53 }
  0xba   :  { %v73_v58 = vpack.c.bf16 %v70_v56, %v69_v55 }
  0xbb   :  { %v74_v59 = vpack.c.bf16 %v72_v57, %v71_v54 }
  0xbc   :  { %268 = vmatmul.mubr.bf16.vlgmr.msra.gmra.mrb[0].mxu0 %v73_v58  ;;  %457 = vmatprep.mubr.bf16.mxu1 %v73_v58 }
  0xbd   :  { %458 = vmatmul.mubr.bf16.vlgmr.msra.gmra.mrb[0].mxu1 %v74_v59  ;;  %277 = vmatprep.mubr.bf16.mxu0 %v532_v28 }
  0xc4   :  { %278 = vmatmul.mubr.bf16.gmra.mrb[4].mxu0 %v74_v59 }
 0x18f   :  { %v269_v60 = vpop.f32.mrb[0].mxu0 }
 0x190   :  { %v271_v61 = vpop.f32.mrb[1].mxu0  ;;  %v459_v62 = vpop.f32.mrb[0].mxu1 }
 0x191   :  { %v423_v63 = vpack.c.bf16 %v271_v61, %v269_v60  ;;  %v428_v0 = vpack.c.bf16 %v459_v62, %v459_v62  ;;  %v273_v1 = vpop.f32.mrb[2].mxu0  ;;  %v322_v2 = vpop.f32.mrb[1].mxu1 }
 0x192   :  { %v424_v3 = vpack.c.bf16 %v322_v2, %v322_v2  ;;  %v275_v4 = vpop.f32.mrb[3].mxu0  ;;  %v460_v5 = vpop.f32.mrb[2].mxu1 }
 0x193   :  { %377 = vst [vmem:[%s627_s3] sm:$0xff] %v423_v63  ;;  %382 = vst [vmem:[%s627_s3 + $0x20] sm:$0xf] %v428_v0  ;;  %v425_v6 = vpack.c.bf16 %v275_v4, %v273_v1  ;;  %v430_v7 = vpack.c.bf16 %v460_v5, %v460_v5  ;;  %v325_v8 = vpop.f32.mrb[3].mxu1 }
 0x194   :  { %378 = vst [vmem:[%s627_s3 + $0x8] sm:$0xf] %v424_v3  ;;  %v426_v9 = vpack.c.bf16 %v325_v8, %v325_v8 }
 0x195   :  { %379 = vst [vmem:[%s627_s3 + $0xc] sm:$0xff] %v425_v6  ;;  %384 = vst [vmem:[%s627_s3 + $0x2c] sm:$0xf] %v430_v7 }
 0x196   :  { %380 = vst [vmem:[%s627_s3 + $0x14] sm:$0xf] %v426_v9 }
 0x197   :  { %v279_v10 = vpop.f32.mrb[4].mxu0 }
 0x198   :  { %v281_v11 = vpop.f32.mrb[5].mxu0 }
 0x199   :  { %v427_v12 = vpack.c.bf16 %v281_v11, %v279_v10  ;;  %v283_v13 = vpop.f32.mrb[6].mxu0 }
 0x19a   :  { %v285_v14 = vpop.f32.mrb[7].mxu0 }
 0x19b   :  { %381 = vst [vmem:[%s627_s3 + $0x18] sm:$0xff] %v427_v12  ;;  %v429_v15 = vpack.c.bf16 %v285_v14, %v283_v13 }
 0x19d   :  { %383 = vst [vmem:[%s627_s3 + $0x24] sm:$0xff] %v429_v15 }
 0x19e   :  { %389 = vsyncpa [#allocation3], 1 }

// kernel: block_forward.6
= control target key start
LH: loop header
LB: loop body
LE: loop exit
PB: predicated region body
PF: predicated region fallthrough
CT: control target
= control target key end

     0   :  { %s311_s1 = inlined_call_operand.vmem [shape: bf16[128,128], index: 1, kind: input, shape index: {}]   ;;  %s312_s0 = inlined_call_operand.vmem [shape: bf16[32,128], index: 0, kind: input, shape index: {}]   ;;  %s313_s2 = inlined_call_operand.vmem [shape: f32[32,128], index: 2, kind: input, shape index: {}]   ;;  %s314_s3 = inlined_call_operand.vmem [shape: f32[32,128], index: 3, kind: output, shape index: {}]  }
   0x1   :  { %v227_v0 = vld [vmem:[%s311_s1] sm:$0xff]   ;;  %v228_v1 = vld [vmem:[%s311_s1 + $0x8] sm:$0xff]   ;;  %v229_v2 = vld [vmem:[%s311_s1 + $0x10] sm:$0xff]  }
   0x2   :  { %207 = vmatprep.subr.bf16.mxu0 %v227_v0  ;;  %v230_v3 = vld [vmem:[%s311_s1 + $0x18] sm:$0xff]   ;;  %v235_v4 = vld [vmem:[%s312_s0] sm:$0xff]   ;;  %v232_v6 = vld [vmem:[%s311_s1 + $0x28] sm:$0xff]  }
   0x3   :  { %208 = vmatpush3.bf16.msra.mxu0 %v227_v0  ;;  %223 = vmatprep.mubr.bf16.mxu0 %v235_v4  ;;  %v231_v5 = vld [vmem:[%s311_s1 + $0x20] sm:$0xff]   ;;  %v233_v7 = vld [vmem:[%s311_s1 + $0x30] sm:$0xff]   ;;  %v234_v8 = vld [vmem:[%s311_s1 + $0x38] sm:$0xff]  }
   0x4   :  { %209 = vmatprep.subr.bf16.mxu0 %v228_v1  ;;  %v236_v9 = vld [vmem:[%s312_s0 + $0x8] sm:$0xff]   ;;  %v169_v10 = vld [vmem:[%s313_s2 + $0x10] sm:$0xff]  ;;  %v167_v11 = vld [vmem:[%s313_s2] sm:$0xff] }
   0x5   :  { %v170_v13 = vld [vmem:[%s313_s2 + $0x18] sm:$0xff]  ;;  %v168_v16 = vld [vmem:[%s313_s2 + $0x8] sm:$0xff] }
   0x7   :  { %210 = vmatpush3.bf16.msra.mxu0 %v228_v1 }
   0x8   :  { %211 = vmatprep.subr.bf16.mxu0 %v229_v2 }
   0xb   :  { %212 = vmatpush3.bf16.msra.mxu0 %v229_v2 }
   0xc   :  { %213 = vmatprep.subr.bf16.mxu0 %v230_v3 }
   0xf   :  { %214 = vmatpush3.bf16.msra.mxu0 %v230_v3 }
  0x10   :  { %215 = vmatprep.subr.bf16.mxu0 %v231_v5 }
  0x13   :  { %216 = vmatpush3.bf16.msra.mxu0 %v231_v5 }
  0x14   :  { %217 = vmatprep.subr.bf16.mxu0 %v232_v6 }
  0x17   :  { %218 = vmatpush3.bf16.msra.mxu0 %v232_v6 }
  0x18   :  { %219 = vmatprep.subr.bf16.mxu0 %v233_v7 }
  0x1b   :  { %220 = vmatpush3.bf16.msra.mxu0 %v233_v7 }
  0x1c   :  { %221 = vmatprep.subr.bf16.mxu0 %v234_v8 }
  0x1f   :  { %222 = vmatpush3.bf16.msra.mxu0 %v234_v8 }
  0x22   :  { %224 = vmatmul.mubr.bf16.vlgmr.msra.gmra.mrb[0].mxu0 %v236_v9 }
  0xf5   :  { %v225_v12 = vpop.f32.mrb[0].mxu0 }
  0xf6   :  { %v177_v14 = vadd.f32 %v225_v12, %v169_v10  ;;  %v141_v15 = vpop.f32.mrb[1].mxu0 }
  0xf7   :  { %v175_v17 = vadd.f32 %v167_v11, %v141_v15  ;;  %v226_v18 = vpop.f32.mrb[2].mxu0 }
  0xf8   :  { %181 = vst [vmem:[%s314_s3 + $0x10] sm:$0xff] %v177_v14  ;;  %v178_v19 = vadd.f32 %v226_v18, %v170_v13  ;;  %v144_v20 = vpop.f32.mrb[3].mxu0 }
  0xf9   :  { %179 = vst [vmem:[%s314_s3] sm:$0xff] %v175_v17  ;;  %v176_v21 = vadd.f32 %v168_v16, %v144_v20 }
  0xfa   :  { %182 = vst [vmem:[%s314_s3 + $0x18] sm:$0xff] %v178_v19 }
  0xfb   :  { %180 = vst [vmem:[%s314_s3 + $0x8] sm:$0xff] %v176_v21 }

// kernel: block_forward.7
= control target key start
LH: loop header
LB: loop body
LE: loop exit
PB: predicated region body
PF: predicated region fallthrough
CT: control target
= control target key end

     0   :  { %v1578_v40 = vmov 0   ;;  %s2037_s0 = inlined_call_operand.vmem [shape: f32[32,128], index: 0, kind: input, shape index: {}]   ;;  %s2038_s1 = inlined_call_operand.vmem [shape: f32[1,128], index: 1, kind: input, shape index: {}]   ;;  %s2039_s2 = inlined_call_operand.vmem [shape: bf16[128,512], index: 2, kind: input, shape index: {}]   ;;  %s2040_s3 = inlined_call_operand.vmem [shape: bf16[128,512], index: 3, kind: input, shape index: {}]   ;;  %s2041_s4 = inlined_call_operand.vmem [shape: bf16[512,128], index: 4, kind: input, shape index: {}]   ;;  %s2042_s5 = inlined_call_operand.hbm [shape: f32[32,128], index: 5, kind: output, shape index: {}]  }
   0x1   :  { %v1615_v0 = vld [vmem:[%s2037_s0] sm:$0xff]  ;;  %v1620_v1 = vld [vmem:[%s2037_s0 + $0x8] sm:$0xff]  ;;  %v1625_v2 = vld [vmem:[%s2037_s0 + $0x10] sm:$0xff]  ;;  %304 = vmatprep.mubr.bf16.mxu0 %v1578_v40  ;;  %357 = vmatprep.mubr.bf16.mxu1 %v1578_v40 }
   0x2   :  { %v34_v3 = vmul.f32 %v1615_v0, %v1615_v0  ;;  %v36_v4 = vmul.f32 %v1625_v2, %v1625_v2  ;;  %v1634_v5 = vld [vmem:[%s2037_s0 + $0x18] sm:$0xff]  ;;  %v1354_v6 = vld [vmem:[%s2039_s2 + $0x4] ss:$16 sps:$4 sm:$0xff]   ;;  %v35_v7 = vmul.f32 %v1620_v1, %v1620_v1  ;;  %v1358_v10 = vld [vmem:[%s2039_s2] ss:$16 sps:$4 sm:$0xff]  }
   0x3   :  { %v37_v8 = vmul.f32 %v1634_v5, %v1634_v5  ;;  %v1356_v9 = vld [vmem:[%s2039_s2 + $0xc] ss:$16 sps:$4 sm:$0xff]   ;;  %v1359_v11 = vld [vmem:[%s2039_s2 + $0x8] ss:$16 sps:$4 sm:$0xff]   ;;  %272 = vmatprep.subr.bf16.mxu0 %v1354_v6  ;;  %v1360_v12 = vld [vmem:[%s2039_s2 + $0x24] ss:$16 sps:$4 sm:$0xff]  }
   0x4   :  { %38 = vadd.xlane.f32.xlu0 %v34_v3  ;;  %42 = vadd.xlane.f32.xlu1 %v36_v4  ;;  %v1362_v13 = vld [vmem:[%s2039_s2 + $0x2c] ss:$16 sps:$4 sm:$0xff]   ;;  %v1364_v14 = vld [vmem:[%s2039_s2 + $0x20] ss:$16 sps:$4 sm:$0xff]   ;;  %v1365_v15 = vld [vmem:[%s2039_s2 + $0x28] ss:$16 sps:$4 sm:$0xff]  }
   0x5   :  { %325 = vmatprep.subr.bf16.mxu1 %v1356_v9  ;;  %273 = vmatpush1.bf16.msra.mxu0 %v1358_v10  ;;  %v1366_v16 = vld [vmem:[%s2039_s2 + $0x44] ss:$16 sps:$4 sm:$0xff]   ;;  %v1368_v17 = vld [vmem:[%s2039_s2 + $0x4c] ss:$16 sps:$4 sm:$0xff]   ;;  %v1370_v18 = vld [vmem:[%s2039_s2 + $0x40] ss:$16 sps:$4 sm:$0xff]  }
   0x6   :  { %326 = vmatpush1.bf16.msra.mxu1 %v1359_v11  ;;  %274 = vmatprep.subr.bf16.mxu0 %v1360_v12  ;;  %v1371_v19 = vld [vmem:[%s2039_s2 + $0x48] ss:$16 sps:$4 sm:$0xff]   ;;  %v1372_v20 = vld [vmem:[%s2039_s2 + $0x64] ss:$16 sps:$4 sm:$0xff]   ;;  %v1374_v21 = vld [vmem:[%s2039_s2 + $0x6c] ss:$16 sps:$4 sm:$0xff]  }
   0x7   :  { %327 = vmatprep.subr.bf16.mxu1 %v1362_v13  ;;  %v1376_v22 = vld [vmem:[%s2039_s2 + $0x60] ss:$16 sps:$4 sm:$0xff]   ;;  %v1377_v23 = vld [vmem:[%s2039_s2 + $0x68] ss:$16 sps:$4 sm:$0xff]   ;;  %v1378_v24 = vld [vmem:[%s2039_s2 + $0x84] ss:$16 sps:$4 sm:$0xff]  }
   0x8   :  { %40 = vadd.xlane.f32.xlu0 %v35_v7  ;;  %44 = vadd.xlane.f32.xlu1 %v37_v8  ;;  %v1380_v25 = vld [vmem:[%s2039_s2 + $0x8c] ss:$16 sps:$4 sm:$0xff]   ;;  %v1382_v26 = vld [vmem:[%s2039_s2 + $0x80] ss:$16 sps:$4 sm:$0xff]   ;;  %v1383_v27 = vld [vmem:[%s2039_s2 + $0x88] ss:$16 sps:$4 sm:$0xff]  }
   0x9   :  { %275 = vmatpush1.bf16.msra.mxu0 %v1364_v14  ;;  %v1384_v28 = vld [vmem:[%s2039_s2 + $0xa4] ss:$16 sps:$4 sm:$0xff]   ;;  %v1386_v29 = vld [vmem:[%s2039_s2 + $0xac] ss:$16 sps:$4 sm:$0xff]   ;;  %v1388_v30 = vld [vmem:[%s2039_s2 + $0xa0] ss:$16 sps:$4 sm:$0xff]  }
   0xa   :  { %328 = vmatpush1.bf16.msra.mxu1 %v1365_v15  ;;  %276 = vmatprep.subr.bf16.mxu0 %v1366_v16  ;;  %v1389_v31 = vld [vmem:[%s2039_s2 + $0xa8] ss:$16 sps:$4 sm:$0xff]   ;;  %v1390_v32 = vld [vmem:[%s2039_s2 + $0xc4] ss:$16 sps:$4 sm:$0xff]   ;;  %v1392_v33 = vld [vmem:[%s2039_s2 + $0xcc] ss:$16 sps:$4 sm:$0xff]  }
   0xb   :  { %329 = vmatprep.subr.bf16.mxu1 %v1368_v17  ;;  %v1394_v34 = vld [vmem:[%s2039_s2 + $0xc0] ss:$16 sps:$4 sm:$0xff]   ;;  %v1395_v35 = vld [vmem:[%s2039_s2 + $0xc8] ss:$16 sps:$4 sm:$0xff]   ;;  %v1396_v36 = vld [vmem:[%s2039_s2 + $0xe4] ss:$16 sps:$4 sm:$0xff]  }
   0xc   :  { %v1398_v37 = vld [vmem:[%s2039_s2 + $0xec] ss:$16 sps:$4 sm:$0xff]   ;;  %v1400_v38 = vld [vmem:[%s2039_s2 + $0xe0] ss:$16 sps:$4 sm:$0xff]   ;;  %v1401_v39 = vld [vmem:[%s2039_s2 + $0xe8] ss:$16 sps:$4 sm:$0xff]  }
   0xd   :  { %277 = vmatpush1.bf16.msra.mxu0 %v1370_v18  ;;  %v1404_v41 = vld [vmem:[%s2040_s3 + $0x4] ss:$16 sps:$4 sm:$0xff]   ;;  %v1407_v42 = vld [vmem:[%s2040_s3 + $0xc] ss:$16 sps:$4 sm:$0xff]  }
   0xe   :  { %330 = vmatpush1.bf16.msra.mxu1 %v1371_v19  ;;  %278 = vmatprep.subr.bf16.mxu0 %v1372_v20 }
   0xf   :  { %331 = vmatprep.subr.bf16.mxu1 %v1374_v21 }
  0x11   :  { %279 = vmatpush1.bf16.msra.mxu0 %v1376_v22 }
  0x12   :  { %332 = vmatpush1.bf16.msra.mxu1 %v1377_v23  ;;  %280 = vmatprep.subr.bf16.mxu0 %v1378_v24 }
  0x13   :  { %333 = vmatprep.subr.bf16.mxu1 %v1380_v25 }
  0x15   :  { %281 = vmatpush1.bf16.msra.mxu0 %v1382_v26 }
  0x16   :  { %334 = vmatpush1.bf16.msra.mxu1 %v1383_v27  ;;  %282 = vmatprep.subr.bf16.mxu0 %v1384_v28 }
  0x17   :  { %335 = vmatprep.subr.bf16.mxu1 %v1386_v29 }
  0x19   :  { %283 = vmatpush1.bf16.msra.mxu0 %v1388_v30 }
  0x1a   :  { %336 = vmatpush1.bf16.msra.mxu1 %v1389_v31  ;;  %284 = vmatprep.subr.bf16.mxu0 %v1390_v32 }
  0x1b   :  { %337 = vmatprep.subr.bf16.mxu1 %v1392_v33 }
  0x1d   :  { %285 = vmatpush1.bf16.msra.mxu0 %v1394_v34 }
  0x1e   :  { %338 = vmatpush1.bf16.msra.mxu1 %v1395_v35  ;;  %286 = vmatprep.subr.bf16.mxu0 %v1396_v36 }
  0x1f   :  { %339 = vmatprep.subr.bf16.mxu1 %v1398_v37 }
  0x21   :  { %287 = vmatpush1.bf16.msra.mxu0 %v1400_v38 }
  0x22   :  { %340 = vmatpush1.bf16.msra.mxu1 %v1401_v39  ;;  %570 = vmatprep.subr.bf16.mxu0 %v1404_v41 }
  0x23   :  { %623 = vmatprep.subr.bf16.mxu1 %v1407_v42 }
  0x24   :  { %10 = vsyncpa [#allocation5], 0  ;;  %v1197_v58 = vld [vmem:[%s2038_s1] ss:$0 sm:$0xff]  ;;  %v1405_v4 = vld [vmem:[%s2040_s3 + $0x8] ss:$16 sps:$4 sm:$0xff]  }
  0x25   :  { %v1402_v3 = vld [vmem:[%s2040_s3] ss:$16 sps:$4 sm:$0xff]   ;;  %v1410_v6 = vld [vmem:[%s2040_s3 + $0x24] ss:$16 sps:$4 sm:$0xff]   ;;  %v1411_v10 = vld [vmem:[%s2040_s3 + $0x28] ss:$16 sps:$4 sm:$0xff]  }
  0x26   :  { %v1408_v9 = vld [vmem:[%s2040_s3 + $0x20] ss:$16 sps:$4 sm:$0xff]   ;;  %v1417_v14 = vld [vmem:[%s2040_s3 + $0x48] ss:$16 sps:$4 sm:$0xff]   ;;  %v1422_v16 = vld [vmem:[%s2040_s3 + $0x64] ss:$16 sps:$4 sm:$0xff]  }
  0x27   :  { %v1414_v13 = vld [vmem:[%s2040_s3 + $0x40] ss:$16 sps:$4 sm:$0xff]   ;;  %v1425_v17 = vld [vmem:[%s2040_s3 + $0x6c] ss:$16 sps:$4 sm:$0xff]   ;;  %v1423_v19 = vld [vmem:[%s2040_s3 + $0x68] ss:$16 sps:$4 sm:$0xff]  }
  0x28   :  { %v1420_v18 = vld [vmem:[%s2040_s3 + $0x60] ss:$16 sps:$4 sm:$0xff]   ;;  %v1428_v20 = vld [vmem:[%s2040_s3 + $0x84] ss:$16 sps:$4 sm:$0xff]   ;;  %v1431_v21 = vld [vmem:[%s2040_s3 + $0x8c] ss:$16 sps:$4 sm:$0xff]  }
  0x29   :  { %v1426_v22 = vld [vmem:[%s2040_s3 + $0x80] ss:$16 sps:$4 sm:$0xff]   ;;  %v1429_v23 = vld [vmem:[%s2040_s3 + $0x88] ss:$16 sps:$4 sm:$0xff]   ;;  %v1434_v24 = vld [vmem:[%s2040_s3 + $0xa4] ss:$16 sps:$4 sm:$0xff]  }
  0x2a   :  { %v1437_v25 = vld [vmem:[%s2040_s3 + $0xac] ss:$16 sps:$4 sm:$0xff]   ;;  %v1432_v26 = vld [vmem:[%s2040_s3 + $0xa0] ss:$16 sps:$4 sm:$0xff]   ;;  %v1435_v27 = vld [vmem:[%s2040_s3 + $0xa8] ss:$16 sps:$4 sm:$0xff]  }
  0x2b   :  { %v1440_v28 = vld [vmem:[%s2040_s3 + $0xc4] ss:$16 sps:$4 sm:$0xff]   ;;  %v1443_v29 = vld [vmem:[%s2040_s3 + $0xcc] ss:$16 sps:$4 sm:$0xff]   ;;  %v1438_v30 = vld [vmem:[%s2040_s3 + $0xc0] ss:$16 sps:$4 sm:$0xff]  }
  0x2c   :  { %v1441_v31 = vld [vmem:[%s2040_s3 + $0xc8] ss:$16 sps:$4 sm:$0xff]   ;;  %v1446_v32 = vld [vmem:[%s2040_s3 + $0xe4] ss:$16 sps:$4 sm:$0xff]   ;;  %v1449_v33 = vld [vmem:[%s2040_s3 + $0xec] ss:$16 sps:$4 sm:$0xff]  }
  0x2d   :  { %v1444_v34 = vld [vmem:[%s2040_s3 + $0xe0] ss:$16 sps:$4 sm:$0xff]   ;;  %v1447_v35 = vld [vmem:[%s2040_s3 + $0xe8] ss:$16 sps:$4 sm:$0xff]   ;;  %s1579_s14 = smov [#allocation4]  }
  0x2e   :  { %v1450_v36 = vld [vmem:[%s2041_s4 + $0x40] sm:$0xff]   ;;  %v1455_v41 = vld [vmem:[%s2041_s4 + $0xc8] sm:$0xff]   ;;  %s1186_s15 = sshll.u32 %s1579_s14, 4  ;;  %s1187_s15 = int_to_ptr.vmem [resolvable:$true] %s1186_s15 }
  0x2f   :  { %v1451_v37 = vld [vmem:[%s2041_s4 + $0xc0] sm:$0xff]   ;;  %v1456_v42 = vld [vmem:[%s2041_s4 + $0x8] sm:$0xff]   ;;  %s1554_s16 = scalar_lea.vmem %s1187_s15, 512  ;;  %p1559_p1 = scmp.lt.s32.totalorder %s1187_s15, %s1187_s15 }
  0x30   :  { %v1452_v38 = vld [vmem:[%s2041_s4] sm:$0xff]   ;;  %p1555_p0 = scmp.ne.s32.totalorder %s1187_s15, %s1554_s16  ;;  %p1560_p2 = scmp.lt.s32.totalorder %s1554_s16, %s1554_s16 }
  0x31   :  { %v1453_v39 = vld [vmem:[%s2041_s4 + $0x80] sm:$0xff]  }
  0x32   :  { %p1561_p3 = por %p1560_p2, %p1559_p1 }
  0x34   :  { %p1562_p4 = pnand %p1561_p3, %p1555_p0 }
  0x91   :  { %v39_v43 = vpop.xlane.xlu0 %38  ;;  %v43_v44 = vpop.xlane.xlu1 %42 }
  0x92   :  { %v47_v45 = vmul.f32 0.0078125, %v39_v43  ;;  %v49_v46 = vmul.f32 0.0078125, %v43_v44  ;;  %v1457_v43 = vld [vmem:[%s2041_s4 + $0x88] sm:$0xff]   ;;  %v1458_v44 = vld [vmem:[%s2041_s4 + $0x50] sm:$0xff]  }
  0x94   :  { %v51_v47 = vadd.f32 1e-05, %v47_v45  ;;  %v53_v52 = vadd.f32 1e-05, %v49_v46  ;;  %v1459_v45 = vld [vmem:[%s2041_s4 + $0xd0] sm:$0xff]  }
  0x95   :  { %v41_v48 = vpop.xlane.xlu0 %40  ;;  %v45_v49 = vpop.xlane.xlu1 %44  ;;  %v1460_v46 = vld [vmem:[%s2041_s4 + $0x10] sm:$0xff]  }
  0x96   :  { %1482 = vrsqrt.f32 %v51_v47  ;;  %v48_v50 = vmul.f32 0.0078125, %v41_v48  ;;  %v50_v51 = vmul.f32 0.0078125, %v45_v49  ;;  %v1461_v47 = vld [vmem:[%s2041_s4 + $0x90] sm:$0xff]   ;;  %v1462_v48 = vld [vmem:[%s2041_s4 + $0x58] sm:$0xff]  }
  0x97   :  { %v1463_v49 = vld [vmem:[%s2041_s4 + $0xd8] sm:$0xff]  }
  0x98   :  { %v52_v53 = vadd.f32 1e-05, %v48_v50  ;;  %v54_v54 = vadd.f32 1e-05, %v50_v51  ;;  %v1464_v50 = vld [vmem:[%s2041_s4 + $0x18] sm:$0xff]  }
  0x99   :  { %v1465_v51 = vld [vmem:[%s2041_s4 + $0x98] sm:$0xff]  }
  0x9a   :  { %1484 = vrsqrt.f32 %v52_v53  ;;  %v1467_v53 = vld [vmem:[%s2041_s4 + $0xe0] sm:$0xff]  }
  0x9b   :  { %1486 = vrsqrt.f32 %v53_v52  ;;  %v1466_v52 = vld [vmem:[%s2041_s4 + $0x60] sm:$0xff]  }
  0x9c   :  { %1488 = vrsqrt.f32 %v54_v54  ;;  %v1468_v54 = vld [vmem:[%s2041_s4 + $0x20] sm:$0xff]  }
  0xa0   :  { %v1483_v55 = vpop.eup %1482 }
  0xa1   :  { %v59_v56 = vmul.f32 %v1483_v55, %v1615_v0  ;;  %v1469_v55 = vld [vmem:[%s2041_s4 + $0xa0] sm:$0xff]  }
  0xa3   :  { %v70_v62 = vmul.f32 %v1197_v58, %v59_v56  ;;  %v1470_v56 = vld [vmem:[%s2041_s4 + $0x68] sm:$0xff]  }
  0xa4   :  { %v1485_v57 = vpop.eup %1484 }
  0xa5   :  { %v1487_v59 = vpop.eup %1486  ;;  %v60_v60 = vmul.f32 %v1485_v57, %v1620_v1  ;;  %v1413_v1 = vld [vmem:[%s2040_s3 + $0x2c] ss:$16 sps:$4 sm:$0xff]  }
  0xa6   :  { %v1489_v61 = vpop.eup %1488  ;;  %v61_v7 = vmul.f32 %v1487_v59, %v1625_v2  ;;  %v1416_v2 = vld [vmem:[%s2040_s3 + $0x44] ss:$16 sps:$4 sm:$0xff]   ;;  %v1471_v57 = vld [vmem:[%s2041_s4 + $0xe8] sm:$0xff]  }
  0xa7   :  { %v71_v63 = vmul.f32 %v1197_v58, %v60_v60  ;;  %v62_v8 = vmul.f32 %v1489_v61, %v1634_v5  ;;  %v1419_v5 = vld [vmem:[%s2040_s3 + $0x4c] ss:$16 sps:$4 sm:$0xff]   ;;  %v1474_v60 = vld [vmem:[%s2041_s4 + $0x70] sm:$0xff]  }
  0xa8   :  { %v72_v11 = vmul.f32 %v1197_v58, %v61_v7  ;;  %v1473_v59 = vld [vmem:[%s2041_s4 + $0xa8] sm:$0xff]   ;;  %v1475_v61 = vld [vmem:[%s2041_s4 + $0xf0] sm:$0xff]  }
  0xa9   :  { %v1755_v0 = vpack.c.bf16 %v71_v63, %v70_v62  ;;  %v73_v12 = vmul.f32 %v1197_v58, %v62_v8  ;;  %v1472_v58 = vld [vmem:[%s2041_s4 + $0x28] sm:$0xff]   ;;  %v1476_v62 = vld [vmem:[%s2041_s4 + $0x30] sm:$0xff]  }
  0xaa   :  { %v1477_v63 = vld [vmem:[%s2041_s4 + $0xb0] sm:$0xff]  }
  0xab   :  { %305 = vmatmul.mubr.bf16.vlgmr.msra.gmra.mrb[0].mxu0 %v1755_v0  ;;  %358 = vmatmul.mubr.bf16.vlgmr.msra.gmra.mrb[0].mxu1 %v1755_v0  ;;  %v75_v15 = vpack.c.bf16 %v73_v12, %v72_v11 }
  0xac   :  { %571 = vmatpush1.bf16.msra.mxu0 %v1402_v3  ;;  %624 = vmatpush1.bf16.msra.mxu1 %v1405_v4  ;;  %v1478_v3 = vld [vmem:[%s2041_s4 + $0x78] sm:$0xff]  }
  0xad   :  { %572 = vmatprep.subr.bf16.mxu0 %v1410_v6  ;;  %625 = vmatprep.subr.bf16.mxu1 %v1413_v1  ;;  %v1479_v4 = vld [vmem:[%s2041_s4 + $0xf8] sm:$0xff]  }
  0xae   :  { %314 = vmatprep.mubr.bf16.mxu0 %v1578_v40  ;;  %367 = vmatprep.mubr.bf16.mxu1 %v1578_v40  ;;  %v1481_v6 = vld [vmem:[%s2041_s4 + $0xb8] sm:$0xff]  }
  0xb0   :  { %573 = vmatpush1.bf16.msra.mxu0 %v1408_v9  ;;  %626 = vmatpush1.bf16.msra.mxu1 %v1411_v10 }
  0xb1   :  { %574 = vmatprep.subr.bf16.mxu0 %v1416_v2  ;;  %627 = vmatprep.subr.bf16.mxu1 %v1419_v5 }
  0xb3   :  { %315 = vmatmul.mubr.bf16.gmra.mrb[4].mxu0 %v75_v15  ;;  %368 = vmatmul.mubr.bf16.gmra.mrb[4].mxu1 %v75_v15 }
  0xb4   :  { %575 = vmatpush1.bf16.msra.mxu0 %v1414_v13  ;;  %628 = vmatpush1.bf16.msra.mxu1 %v1417_v14 }
  0xb5   :  { %576 = vmatprep.subr.bf16.mxu0 %v1422_v16  ;;  %629 = vmatprep.subr.bf16.mxu1 %v1425_v17 }
  0xb6   :  { %602 = vmatprep.mubr.bf16.mxu0 %v1578_v40  ;;  %655 = vmatprep.mubr.bf16.mxu1 %v1578_v40 }
  0xb8   :  { %577 = vmatpush1.bf16.msra.mxu0 %v1420_v18  ;;  %630 = vmatpush1.bf16.msra.mxu1 %v1423_v19 }
  0xb9   :  { %578 = vmatprep.subr.bf16.mxu0 %v1428_v20  ;;  %631 = vmatprep.subr.bf16.mxu1 %v1431_v21 }
  0xbc   :  { %579 = vmatpush1.bf16.msra.mxu0 %v1426_v22  ;;  %632 = vmatpush1.bf16.msra.mxu1 %v1429_v23 }
  0xbd   :  { %580 = vmatprep.subr.bf16.mxu0 %v1434_v24  ;;  %633 = vmatprep.subr.bf16.mxu1 %v1437_v25 }
  0xc0   :  { %581 = vmatpush1.bf16.msra.mxu0 %v1432_v26  ;;  %634 = vmatpush1.bf16.msra.mxu1 %v1435_v27 }
  0xc1   :  { %582 = vmatprep.subr.bf16.mxu0 %v1440_v28  ;;  %635 = vmatprep.subr.bf16.mxu1 %v1443_v29 }
  0xc4   :  { %583 = vmatpush1.bf16.msra.mxu0 %v1438_v30  ;;  %636 = vmatpush1.bf16.msra.mxu1 %v1441_v31 }
  0xc5   :  { %584 = vmatprep.subr.bf16.mxu0 %v1446_v32  ;;  %637 = vmatprep.subr.bf16.mxu1 %v1449_v33 }
  0xc8   :  { %585 = vmatpush1.bf16.msra.mxu0 %v1444_v34  ;;  %638 = vmatpush1.bf16.msra.mxu1 %v1447_v35 }
  0xc9   :  { %1294 = vmatprep.subr.bf16.mxu0 %v1450_v36  ;;  %1322 = vmatprep.subr.bf16.mxu1 %v1451_v37 }
  0xcb   :  { %603 = vmatmul.mubr.bf16.vlgmr.msra.gmra.mrb[8].mxu0 %v1755_v0  ;;  %656 = vmatmul.mubr.bf16.vlgmr.msra.gmra.mrb[8].mxu1 %v1755_v0  ;;  %v1480_v0 = vld [vmem:[%s2041_s4 + $0x38] sm:$0xff]  }
  0xcc   :  { %612 = vmatprep.mubr.bf16.mxu0 %v1578_v40  ;;  %665 = vmatprep.mubr.bf16.mxu1 %v1578_v40  ;;  %v1454_v40 = vld [vmem:[%s2041_s4 + $0x48] sm:$0xff]  }
  0xcd   :  { %1295 = vmatpush3.bf16.msra.mxu0 %v1452_v38  ;;  %1323 = vmatpush3.bf16.msra.mxu1 %v1453_v39 }
  0xce   :  { %1296 = vmatprep.subr.bf16.mxu0 %v1454_v40  ;;  %1324 = vmatprep.subr.bf16.mxu1 %v1455_v41 }
  0xd1   :  { %1297 = vmatpush3.bf16.msra.mxu0 %v1456_v42  ;;  %1325 = vmatpush3.bf16.msra.mxu1 %v1457_v43 }
  0xd2   :  { %1298 = vmatprep.subr.bf16.mxu0 %v1458_v44  ;;  %1326 = vmatprep.subr.bf16.mxu1 %v1459_v45 }
  0xd3   :  { %613 = vmatmul.mubr.bf16.gmra.mrb[12].mxu0 %v75_v15  ;;  %666 = vmatmul.mubr.bf16.gmra.mrb[12].mxu1 %v75_v15 }
  0xd5   :  { %1299 = vmatpush3.bf16.msra.mxu0 %v1460_v46  ;;  %1327 = vmatpush3.bf16.msra.mxu1 %v1461_v47 }
  0xd6   :  { %1300 = vmatprep.subr.bf16.mxu0 %v1462_v48  ;;  %1328 = vmatprep.subr.bf16.mxu1 %v1463_v49 }
  0xd9   :  { %1301 = vmatpush3.bf16.msra.mxu0 %v1464_v50  ;;  %1329 = vmatpush3.bf16.msra.mxu1 %v1465_v51 }
  0xda   :  { %1302 = vmatprep.subr.bf16.mxu0 %v1466_v52  ;;  %1330 = vmatprep.subr.bf16.mxu1 %v1467_v53 }
  0xdd   :  { %1303 = vmatpush3.bf16.msra.mxu0 %v1468_v54  ;;  %1331 = vmatpush3.bf16.msra.mxu1 %v1469_v55 }
  0xde   :  { %1304 = vmatprep.subr.bf16.mxu0 %v1470_v56  ;;  %1332 = vmatprep.subr.bf16.mxu1 %v1471_v57 }
  0xe1   :  { %1305 = vmatpush3.bf16.msra.mxu0 %v1472_v58  ;;  %1333 = vmatpush3.bf16.msra.mxu1 %v1473_v59 }
  0xe2   :  { %1306 = vmatprep.subr.bf16.mxu0 %v1474_v60  ;;  %1334 = vmatprep.subr.bf16.mxu1 %v1475_v61 }
  0xe5   :  { %1307 = vmatpush3.bf16.msra.mxu0 %v1476_v62  ;;  %1335 = vmatpush3.bf16.msra.mxu1 %v1477_v63 }
  0xe6   :  { %1308 = vmatprep.subr.bf16.mxu0 %v1478_v3  ;;  %1336 = vmatprep.subr.bf16.mxu1 %v1479_v4 }
  0xe9   :  { %1309 = vmatpush3.bf16.msra.mxu0 %v1480_v0  ;;  %1337 = vmatpush3.bf16.msra.mxu1 %v1481_v6 }
 0x17e   :  { %v1949_v1 = vpop.f32.mrb[0].mxu0  ;;  %v1951_v7 = vpop.f32.mrb[0].mxu1 }
 0x17f   :  { %v676_v8 = vsub.f32 0.0, %v1949_v1  ;;  %v678_v9 = vsub.f32 0.0, %v1951_v7  ;;  %v1955_v10 = vpop.f32.mrb[1].mxu0  ;;  %v1957_v2 = vpop.f32.mrb[1].mxu1 }
 0x180   :  { %v677_v5 = vsub.f32 0.0, %v1955_v10  ;;  %v679_v11 = vsub.f32 0.0, %v1957_v2  ;;  %v1961_v12 = vpop.f32.mrb[2].mxu0  ;;  %v1963_v13 = vpop.f32.mrb[2].mxu1 }
 0x181   :  { %v692_v14 = vmul.f32 1.442695, %v676_v8  ;;  %v696_v15 = vmul.f32 1.442695, %v678_v9  ;;  %v680_v16 = vsub.f32 0.0, %v1961_v12  ;;  %v682_v17 = vsub.f32 0.0, %v1963_v13 }
 0x182   :  { %v694_v18 = vmul.f32 1.442695, %v677_v5  ;;  %v698_v19 = vmul.f32 1.442695, %v679_v11  ;;  %v1967_v20 = vpop.f32.mrb[3].mxu0  ;;  %v1969_v21 = vpop.f32.mrb[3].mxu1 }
 0x183   :  { %1490 = vpow2.f32 %v692_v14  ;;  %v700_v22 = vmul.f32 1.442695, %v680_v16  ;;  %v681_v23 = vsub.f32 0.0, %v1967_v20  ;;  %v704_v24 = vmul.f32 1.442695, %v682_v17 }
 0x184   :  { %1492 = vpow2.f32 %v696_v15  ;;  %v683_v25 = vsub.f32 0.0, %v1969_v21 }
 0x185   :  { %1494 = vpow2.f32 %v694_v18  ;;  %v702_v26 = vmul.f32 1.442695, %v681_v23 }
 0x186   :  { %1496 = vpow2.f32 %v698_v19  ;;  %v706_v27 = vmul.f32 1.442695, %v683_v25  ;;  %v1973_v28 = vpop.f32.mrb[4].mxu0  ;;  %v1975_v29 = vpop.f32.mrb[4].mxu1 }
 0x187   :  { %1498 = vpow2.f32 %v700_v22  ;;  %v684_v30 = vsub.f32 0.0, %v1973_v28  ;;  %v686_v31 = vsub.f32 0.0, %v1975_v29  ;;  %v1979_v32 = vpop.f32.mrb[5].mxu0  ;;  %v1981_v33 = vpop.f32.mrb[5].mxu1 }
 0x188   :  { %1500 = vpow2.f32 %v704_v24  ;;  %v685_v34 = vsub.f32 0.0, %v1979_v32  ;;  %v687_v35 = vsub.f32 0.0, %v1981_v33  ;;  %v1985_v36 = vpop.f32.mrb[6].mxu0  ;;  %v1987_v37 = vpop.f32.mrb[6].mxu1 }
 0x189   :  { %1502 = vpow2.f32 %v702_v26  ;;  %v708_v38 = vmul.f32 1.442695, %v684_v30  ;;  %v712_v39 = vmul.f32 1.442695, %v686_v31  ;;  %v688_v40 = vsub.f32 0.0, %v1985_v36  ;;  %v1990_v41 = vpop.f32.mrb[7].mxu0 }
 0x18a   :  { %1504 = vpow2.f32 %v706_v27  ;;  %v710_v42 = vmul.f32 1.442695, %v685_v34  ;;  %v714_v43 = vmul.f32 1.442695, %v687_v35  ;;  %v1992_v44 = vpop.f32.mrb[7].mxu1  ;;  %v690_v63 = vsub.f32 0.0, %v1987_v37 }
 0x18b   :  { %1506 = vpow2.f32 %v708_v38  ;;  %v716_v45 = vmul.f32 1.442695, %v688_v40  ;;  %v689_v0 = vsub.f32 0.0, %v1990_v41  ;;  %v691_v9 = vsub.f32 0.0, %v1992_v44 }
 0x18c   :  { %1508 = vpow2.f32 %v712_v39  ;;  %v720_v16 = vmul.f32 1.442695, %v690_v63 }
 0x18d   :  { %v1491_v46 = vpop.eup %1490  ;;  %1510 = vpow2.f32 %v710_v42  ;;  %v718_v19 = vmul.f32 1.442695, %v689_v0  ;;  %v722_v24 = vmul.f32 1.442695, %v691_v9 }
 0x18e   :  { %v1493_v47 = vpop.eup %1492  ;;  %v724_v48 = vadd.f32 1.0, %v1491_v46  ;;  %1512 = vpow2.f32 %v714_v43 }
 0x18f   :  { %v1495_v49 = vpop.eup %1494  ;;  %v726_v50 = vadd.f32 1.0, %v1493_v47  ;;  %1514 = vpow2.f32 %v716_v45 }
 0x190   :  { %v1497_v51 = vpop.eup %1496  ;;  %1516 = vrcp.f32 %v724_v48  ;;  %v725_v52 = vadd.f32 1.0, %v1495_v49 }
 0x191   :  { %v1499_v53 = vpop.eup %1498  ;;  %1518 = vrcp.f32 %v726_v50  ;;  %v727_v54 = vadd.f32 1.0, %v1497_v51 }
 0x192   :  { %v1501_v55 = vpop.eup %1500  ;;  %1520 = vrcp.f32 %v725_v52  ;;  %v728_v56 = vadd.f32 1.0, %v1499_v53 }
 0x193   :  { %v1503_v57 = vpop.eup %1502  ;;  %1522 = vrcp.f32 %v727_v54  ;;  %v730_v58 = vadd.f32 1.0, %v1501_v55 }
 0x194   :  { %v1505_v59 = vpop.eup %1504  ;;  %1524 = vrcp.f32 %v728_v56  ;;  %v729_v60 = vadd.f32 1.0, %v1503_v57 }
 0x195   :  { %v1507_v61 = vpop.eup %1506  ;;  %1526 = vrcp.f32 %v730_v58  ;;  %v731_v62 = vadd.f32 1.0, %v1505_v59 }
 0x196   :  { %v1509_v3 = vpop.eup %1508  ;;  %1528 = vrcp.f32 %v729_v60  ;;  %v732_v4 = vadd.f32 1.0, %v1507_v61 }
 0x197   :  { %v1511_v6 = vpop.eup %1510  ;;  %1530 = vrcp.f32 %v731_v62  ;;  %v734_v8 = vadd.f32 1.0, %v1509_v3 }
 0x198   :  { %v1513_v5 = vpop.eup %1512  ;;  %1532 = vrcp.f32 %v732_v4  ;;  %v733_v11 = vadd.f32 1.0, %v1511_v6 }
 0x199   :  { %v1515_v14 = vpop.eup %1514  ;;  %1534 = vrcp.f32 %v734_v8  ;;  %v735_v15 = vadd.f32 1.0, %v1513_v5 }
 0x19a   :  { %v1517_v17 = vpop.eup %1516  ;;  %1536 = vrcp.f32 %v733_v11  ;;  %v736_v18 = vadd.f32 1.0, %v1515_v14 }
 0x19b   :  { %v1519_v22 = vpop.eup %1518  ;;  %v756_v23 = vmul.f32 %v1517_v17, %v1949_v1  ;;  %1538 = vrcp.f32 %v735_v15 }
 0x19c   :  { %v1521_v25 = vpop.eup %1520  ;;  %v758_v26 = vmul.f32 %v1519_v22, %v1951_v7  ;;  %1540 = vrcp.f32 %v736_v18 }
 0x19d   :  { %v1523_v27 = vpop.eup %1522  ;;  %v757_v30 = vmul.f32 %v1521_v25, %v1955_v10  ;;  %1542 = vpow2.f32 %v720_v16 }
 0x19e   :  { %v1525_v31 = vpop.eup %1524  ;;  %v759_v34 = vmul.f32 %v1523_v27, %v1957_v2  ;;  %1544 = vpow2.f32 %v718_v19  ;;  %v604_v35 = vpop.f32.mrb[8].mxu0 }
 0x19f   :  { %v657_v38 = vpop.f32.mrb[8].mxu1  ;;  %v1527_v39 = vpop.eup %1526  ;;  %v760_v40 = vmul.f32 %v1525_v31, %v1961_v12  ;;  %1546 = vpow2.f32 %v722_v24  ;;  %v772_v1 = vmul.f32 %v756_v23, %v604_v35 }
 0x1a0   :  { %v774_v42 = vmul.f32 %v758_v26, %v657_v38  ;;  %v606_v43 = vpop.f32.mrb[9].mxu0  ;;  %v659_v45 = vpop.f32.mrb[9].mxu1  ;;  %v762_v46 = vmul.f32 %v1527_v39, %v1963_v13 }
 0x1a1   :  { %v1529_v7 = vpop.eup %1528  ;;  %v773_v47 = vmul.f32 %v757_v30, %v606_v43  ;;  %v775_v10 = vmul.f32 %v759_v34, %v659_v45  ;;  %v608_v48 = vpop.f32.mrb[10].mxu0 }
 0x1a2   :  { %v661_v49 = vpop.f32.mrb[10].mxu1  ;;  %v1531_v50 = vpop.eup %1530  ;;  %v761_v2 = vmul.f32 %v1529_v7, %v1967_v20  ;;  %v776_v51 = vmul.f32 %v760_v40, %v608_v48 }
 0x1a3   :  { %v610_v52 = vpop.f32.mrb[11].mxu0  ;;  %v663_v53 = vpop.f32.mrb[11].mxu1  ;;  %v763_v12 = vmul.f32 %v1531_v50, %v1969_v21  ;;  %v778_v55 = vmul.f32 %v762_v46, %v661_v49 }
 0x1a4   :  { %v1533_v54 = vpop.eup %1532  ;;  %v788_v58 = vpack.c.bf16 %v776_v51, %v772_v1  ;;  %v777_v59 = vmul.f32 %v761_v2, %v610_v52 }
 0x1a5   :  { %v1535_v56 = vpop.eup %1534  ;;  %v764_v57 = vmul.f32 %v1533_v54, %v1973_v28  ;;  %v790_v61 = vpack.c.bf16 %v778_v55, %v774_v42  ;;  %v779_v62 = vmul.f32 %v763_v12, %v663_v53  ;;  %v1166_v54 = vld [vmem:[%s2037_s0 + $0x8] sm:$0xff] }
 0x1a6   :  { %v1537_v13 = vpop.eup %1536  ;;  %v766_v60 = vmul.f32 %v1535_v56, %v1975_v29  ;;  %v789_v3 = vpack.c.bf16 %v777_v59, %v773_v47  ;;  %v614_v21 = vpop.f32.mrb[12].mxu0 }
 0x1a7   :  { %v1539_v63 = vpop.eup %1538  ;;  %v765_v20 = vmul.f32 %v1537_v13, %v1979_v32  ;;  %v791_v6 = vpack.c.bf16 %v779_v62, %v775_v10  ;;  %v667_v8 = vpop.f32.mrb[12].mxu1  ;;  %v780_v5 = vmul.f32 %v764_v57, %v614_v21 }
 0x1a8   :  { %v1541_v4 = vpop.eup %1540  ;;  %v767_v0 = vmul.f32 %v1539_v63, %v1981_v33  ;;  %v782_v11 = vmul.f32 %v766_v60, %v667_v8  ;;  %1088 = vmatprep.mubr.bf16.mxu0 %v789_v3  ;;  %v616_v14 = vpop.f32.mrb[13].mxu0  ;;  %v1167_v3 = vld [vmem:[%s2037_s0 + $0x10] sm:$0xff]  ;;  %v1168_v8 = vld [vmem:[%s2037_s0 + $0x18] sm:$0xff] }
 0x1a9   :  { %v1543_v9 = vpop.eup %1542  ;;  %v768_v28 = vmul.f32 %v1541_v4, %v1985_v36  ;;  %v669_v29 = vpop.f32.mrb[13].mxu1  ;;  %1137 = vmatprep.mubr.bf16.mxu1 %v791_v6  ;;  %v781_v17 = vmul.f32 %v765_v20, %v616_v14  ;;  %1089 = vmatmul.mubr.bf16.vlgmr.msra.gmra.mrb[16].mxu0 %v788_v58 }
 0x1aa   :  { %v1545_v15 = vpop.eup %1544  ;;  %v738_v16 = vadd.f32 1.0, %v1543_v9  ;;  %v783_v32 = vmul.f32 %v767_v0, %v669_v29  ;;  %v618_v18 = vpop.f32.mrb[14].mxu0  ;;  %1138 = vmatmul.mubr.bf16.vlgmr.msra.gmra.mrb[16].mxu1 %v790_v61 }
 0x1ab   :  { %v671_v19 = vpop.f32.mrb[14].mxu1  ;;  %v1547_v33 = vpop.eup %1546  ;;  %v737_v22 = vadd.f32 1.0, %v1545_v15  ;;  %v784_v23 = vmul.f32 %v768_v28, %v618_v18 }
 0x1ac   :  { %v620_v24 = vpop.f32.mrb[15].mxu0  ;;  %v673_v25 = vpop.f32.mrb[15].mxu1  ;;  %1548 = vrcp.f32 %v738_v16  ;;  %v739_v36 = vadd.f32 1.0, %v1547_v33 }
 0x1ad   :  { %1550 = vrcp.f32 %v737_v22  ;;  %v792_v26 = vpack.c.bf16 %v784_v23, %v780_v5 }
 0x1ae   :  { %1552 = vrcp.f32 %v739_v36 }
 0x1b6   :  { %v1549_v27 = vpop.eup %1548 }
 0x1b7   :  { %v1551_v30 = vpop.eup %1550  ;;  %v770_v31 = vmul.f32 %v1549_v27, %v1987_v37 }
 0x1b8   :  { %v1553_v34 = vpop.eup %1552  ;;  %v769_v35 = vmul.f32 %v1551_v30, %v1990_v41 }
 0x1b9   :  { %v771_v38 = vmul.f32 %v1553_v34, %v1992_v44  ;;  %v786_v39 = vmul.f32 %v770_v31, %v671_v19  ;;  %v1165_v44 = vld [vmem:[%s2037_s0] sm:$0xff] }
 0x1ba   :  { %v785_v40 = vmul.f32 %v769_v35, %v620_v24 }
 0x1bb   :  { %v794_v1 = vpack.c.bf16 %v786_v39, %v782_v11  ;;  %v787_v42 = vmul.f32 %v771_v38, %v673_v25 }
 0x1bc   :  { %v793_v43 = vpack.c.bf16 %v785_v40, %v781_v17 }
 0x1bd   :  { %v795_v45 = vpack.c.bf16 %v787_v42, %v783_v32 }
 0x1be   :  { %1096 = vmatprep.mubr.bf16.mxu0 %v793_v43 }
 0x1bf   :  { %1145 = vmatprep.mubr.bf16.mxu1 %v795_v45  ;;  %1097 = vmatmul.mubr.bf16.gmra.mrb[20].mxu0 %v792_v26 }
 0x1c0   :  { %1146 = vmatmul.mubr.bf16.gmra.mrb[20].mxu1 %v794_v1 }
 0x27c   :  { %v1310_v7 = vpop.f32.mrb[16].mxu0 }
 0x27d   :  { %v1338_v46 = vpop.f32.mrb[16].mxu1  ;;  %v1311_v47 = vpop.f32.mrb[17].mxu0 }
 0x27e   :  { %v1312_v10 = vadd.f32 %v1311_v47, %v1310_v7  ;;  %v1339_v37 = vpop.f32.mrb[17].mxu1  ;;  %v1313_v48 = vpop.f32.mrb[18].mxu0 }
 0x27f   :  { %v1340_v49 = vadd.f32 %v1339_v37, %v1338_v46  ;;  %v1341_v41 = vpop.f32.mrb[18].mxu1  ;;  %v1314_v50 = vpop.f32.mrb[19].mxu0 }
 0x280   :  { %v1315_v2 = vadd.f32 %v1314_v50, %v1313_v48  ;;  %v1342_v51 = vpop.f32.mrb[19].mxu1 }
 0x281   :  { %v1140_v52 = vadd.f32 %v1340_v49, %v1312_v10  ;;  %v1343_v53 = vadd.f32 %v1342_v51, %v1341_v41 }
 0x283   :  { %v1173_v12 = vadd.f32 %v1165_v44, %v1140_v52  ;;  %v1143_v55 = vadd.f32 %v1343_v53, %v1315_v2 }
 0x285   :  { %1177 = vst [vmem:[#allocation4] sm:$0xff] %v1173_v12  ;;  %v1174_v56 = vadd.f32 %v1166_v54, %v1143_v55 }
 0x287   :  { %1178 = vst [vmem:[#allocation4 + $0x8] sm:$0xff] %v1174_v56 }
 0x292   :  { %v1316_v57 = vpop.f32.mrb[20].mxu0 }
 0x293   :  { %v1344_v58 = vpop.f32.mrb[20].mxu1  ;;  %v1317_v59 = vpop.f32.mrb[21].mxu0 }
 0x294   :  { %v1318_v13 = vadd.f32 %v1317_v59, %v1316_v57  ;;  %v1345_v60 = vpop.f32.mrb[21].mxu1  ;;  %v1319_v61 = vpop.f32.mrb[22].mxu0 }
 0x295   :  { %v1346_v62 = vadd.f32 %v1345_v60, %v1344_v58  ;;  %v1347_v63 = vpop.f32.mrb[22].mxu1  ;;  %v1320_v20 = vpop.f32.mrb[23].mxu0 }
 0x296   :  { %v1321_v4 = vadd.f32 %v1320_v20, %v1319_v61  ;;  %v1348_v0 = vpop.f32.mrb[23].mxu1 }
 0x297   :  { %v1148_v6 = vadd.f32 %v1346_v62, %v1318_v13  ;;  %v1349_v21 = vadd.f32 %v1348_v0, %v1347_v63 }
 0x299   :  { %v1175_v9 = vadd.f32 %v1167_v3, %v1148_v6  ;;  %v1151_v28 = vadd.f32 %v1349_v21, %v1321_v4 }
 0x29b   :  { %1179 = vst [vmem:[#allocation4 + $0x10] sm:$0xff] %v1175_v9  ;;  %v1176_v5 = vadd.f32 %v1168_v8, %v1151_v28 }
 0x29d   :  { %1180 = vst [vmem:[#allocation4 + $0x18] sm:$0xff] %v1176_v5 }
 0x29e   :  { %1565 = shalt.err (!%p1562_p4)
}
 0x29f   :  { %s1566_s2 = scalar_lea.hbm %s2042_s5, 512 }
 0x2a0   :  { %p1567_p5 = scmp.ne.s32.totalorder %s2042_s5, %s1566_s2  ;;  %p1570_p6 = scmp.lt.u32.totalorder %s1566_s2, %s2042_s5 }
 0x2a2   :  { %p1572_p7 = pnand %p1570_p6, %p1567_p5 }
 0x2a4   :  { %1575 = shalt.err (!%p1572_p7)
}
 0x2a5   :  { %s1580_s22 = smov 128   ;;  %s1581_s23 = smov 8  }
 0x2a6   :  { %1192 = dma.vmem_to_hbm [thread:$0]  %s1187_s15, 512, %s2042_s5, [#allocation5], %s1580_s22, %s1580_s22, %s1581_s23  }
 0x2a7   :  { %1576 = dma.done.wait [#allocation5], 512  }
 0x2a8   :  { %1577 = vsyncadd [#allocation5], 4294966784 }
 0x2a9   :  { %1196 = vsyncpa [#allocation5], 1 }

// kernel: block_forward.5
= control target key start
LH: loop header
LB: loop body
LE: loop exit
PB: predicated region body
PF: predicated region fallthrough
CT: control target
= control target key end

     0   :  { %s2558_s18 = smov 0   ;;  %s2560_s19 = smov 0   ;;  %s3079_s0 = inlined_call_operand.vmem [shape: bf16[2,4,16,32], index: 0, kind: input, shape index: {}]   ;;  %s3080_s1 = inlined_call_operand.vmem [shape: bf16[2,4,16,32], index: 1, kind: input, shape index: {}]   ;;  %s3081_s2 = inlined_call_operand.vmem [shape: bf16[2,4,16,32], index: 2, kind: input, shape index: {}]   ;;  %s3082_s3 = inlined_call_operand.vmem [shape: bf16[4,10,32], index: 3, kind: input, shape index: {}]   ;;  %s3083_s4 = inlined_call_operand.vmem [shape: bf16[4,10,32], index: 4, kind: input, shape index: {}]   ;;  %s3084_s5 = inlined_call_operand.vmem [shape: bf16[2,4,16,32], index: 5, kind: output, shape index: {}]  }
   0x1   :  { %s2562_s20 = smov 0  }
   0x2 LB: > { %s41_s21 = sadd.s32 1, %s2518_s19  ;;  %p2171_p0 = scmp.ge.s32.totalorder %s2522_s20, 1  ;;  %s2522_s20 = sphi %s2562_s20, %s15_s20   ;;  %s2518_s19 = sphi %s2560_s19, %s3089_s19   ;;  %s2514_s18 = sphi %s2558_s18, %s3088_s18  }
   0x3   : > { %p43_p1 = scmp.ge.s32.totalorder %s41_s21, 2  ;;  %p322_p2 = scmp.lt.s32.totalorder %s2522_s20, 3 }
   0x5   : > { %s3091_s21 = smov (%p43_p1, %s41_s21), 0  ;;  %p323_p3 = pnand %p2171_p0, %p322_p2 }
   0x6   : > { %p414_p4 = scmp.lt.s32.totalorder (!%p323_p3), %s2514_s18, 1  ;;  %vm520_vm0 = vcmask (!%p323_p3), 261120   ;;  %v2524_v0 = vmov (!%p323_p3), 0.0   ;;  %vm2525_vm1 = vmmov (!%p323_p3), 0   ;;  %vm503_vm2 = vcmask (!%p323_p3), 7168  }
   0x7   : > { %326 = sbr.rel (%p323_p3) target bundleno = 1329 (0x531), region = 40  ;;  %2274 = vmatprep.subr.bf16.mxu0 (!%p323_p3), %v2524_v0  ;;  %2280 = vmatprep.subr.bf16.mxu1 (!%p323_p3), %v2524_v0  ;;  %521 = vst.msk [vmem:[#allocation4] sm:$0xff] (!%p323_p3), %vm520_vm0, %v2524_v0  ;;  %522 = vst.msk [vmem:[#allocation4 + $0x8] sm:$0xff] (!%p323_p3), %vm520_vm0, %v2524_v0  ;;  %v2526_v13 = vmov (!%p323_p3), -inf   ;;  %v787_v14 = vlaneseq (!%p323_p3)  ;;  %vm820_vm4 = vcmask (!%p323_p3), 130048   ;;  %v2527_v58 = vmov (!%p323_p3), 0  }
   0x8   : > { %523 = vst.msk [vmem:[#allocation4 + $0x10] sm:$0xff] (!%p323_p3), %vm520_vm0, %v2524_v0  ;;  %524 = vst.msk [vmem:[#allocation4 + $0x18] sm:$0xff] (!%p323_p3), %vm520_vm0, %v2524_v0  ;;  %2276 = vmatprep.mubr.msk.bf16.mxu0 (!%p323_p3), %vm2525_vm1, %v2524_v0  ;;  %2282 = vmatprep.mubr.msk.bf16.mxu1 (!%p323_p3), %vm2525_vm1, %v2524_v0  ;;  %vm1546_vm6 = vcmask (!%p323_p3), 80896   ;;  %vm1647_vm7 = vcmask (!%p323_p3), 1044480   ;;  %vm1960_vm8 = vcmask (!%p323_p3), 257024  }
   0x9   : > { %525 = vst.msk [vmem:[#allocation4 + $0x20] sm:$0xff] (!%p323_p3), %vm520_vm0, %v2524_v0  ;;  %526 = vst.msk [vmem:[#allocation4 + $0x28] sm:$0xff] (!%p323_p3), %vm520_vm0, %v2524_v0  ;;  %v788_v15 = vshrl.u32 (!%p323_p3), %v787_v14, 7  ;;  %v795_v16 = vand.u32 (!%p323_p3), 127, %v787_v14  ;;  %2399 = vset.pattern.permute.xlu1 (!%p323_p3), %v2527_v58  ;;  %2398 = vset.pattern.permute.xlu0 (!%p323_p3), %v2527_v58 }
   0xa   : > { %527 = vst.msk [vmem:[#allocation4 + $0x30] sm:$0xff] (!%p323_p3), %vm520_vm0, %v2524_v0  ;;  %528 = vst.msk [vmem:[#allocation4 + $0x38] sm:$0xff] (!%p323_p3), %vm520_vm0, %v2524_v0 }
   0xb   : > { %506 = vst.msk [vmem:[#allocation2 + $0x10] sm:$0xff] (!%p323_p3), %vm503_vm2, %v2526_v13  ;;  %504 = vst.msk [vmem:[#allocation2] sm:$0xff] (!%p323_p3), %vm503_vm2, %v2526_v13  ;;  %v789_v17 = vadd.s32 (!%p323_p3), 8, %v788_v15  ;;  %vm798_vm3 = vcmp.ge.s32.totalorder (!%p323_p3), %v788_v15, %v795_v16 }
   0xc   : > { %505 = vst.msk [vmem:[#allocation2 + $0x8] sm:$0xff] (!%p323_p3), %vm503_vm2, %v2526_v13  ;;  %507 = vst.msk [vmem:[#allocation2 + $0x18] sm:$0xff] (!%p323_p3), %vm503_vm2, %v2526_v13 }
   0xd   : > { %508 = vst.msk [vmem:[#allocation2 + $0x20] sm:$0xff] (!%p323_p3), %vm503_vm2, %v2526_v13  ;;  %509 = vst.msk [vmem:[#allocation2 + $0x28] sm:$0xff] (!%p323_p3), %vm503_vm2, %v2526_v13  ;;  %vm799_vm5 = vcmp.ge.s32.totalorder (!%p323_p3), %v789_v17, %v795_v16 }
   0xe   : > { %s3093_s18 = smov (!%p414_p4, %s2514_s18), 1  ;;  %510 = vst.msk [vmem:[#allocation2 + $0x30] sm:$0xff] %vm503_vm2, %v2526_v13  ;;  %511 = vst.msk [vmem:[#allocation2 + $0x38] sm:$0xff] %vm503_vm2, %v2526_v13 }
   0xf   : > { %s2598_s22 = sshll.u32 %s3093_s18, 5  ;;  %512 = vst.msk [vmem:[#allocation3] sm:$0xff] %vm503_vm2, %v2524_v0  ;;  %513 = vst.msk [vmem:[#allocation3 + $0x8] sm:$0xff] %vm503_vm2, %v2524_v0 }
  0x10   : > { %s443_s25 = scalar_lea.vmem %s3080_s1, %s2598_s22  ;;  %s425_s28 = scalar_lea.vmem %s3079_s0, %s2598_s22  ;;  %514 = vst.msk [vmem:[#allocation3 + $0x10] sm:$0xff] %vm503_vm2, %v2524_v0  ;;  %515 = vst.msk [vmem:[#allocation3 + $0x18] sm:$0xff] %vm503_vm2, %v2524_v0 }
  0x11   : > { %v2400_v1 = vld [vmem:[%s443_s25] sm:$0xff]   ;;  %v2401_v2 = vld [vmem:[%s443_s25 + $0x8] sm:$0xff]   ;;  %v2404_v5 = vld [vmem:[%s443_s25 + $0x10] sm:$0xff]   ;;  %516 = vst.msk [vmem:[#allocation3 + $0x20] sm:$0xff] %vm503_vm2, %v2524_v0  ;;  %s2785_s6 = scalar_lea.vmem %s3081_s2, %s2598_s22  ;;  %s3052_s29 = scalar_lea.vmem %s3084_s5, %s2598_s22 }
  0x12   : > { %v564_v3 = vsel %vm520_vm0, %v2400_v1, 0  ;;  %v621_v4 = vsel %vm520_vm0, %v2401_v2, 0  ;;  %v2405_v6 = vld [vmem:[%s443_s25 + $0x18] sm:$0xff]   ;;  %v2612_v7 = vld [vmem:[%s425_s28] sm:$0xff]   ;;  %v2614_v8 = vld [vmem:[%s425_s28 + $0x8] sm:$0xff]   ;;  %v678_v9 = vsel %vm520_vm0, %v2404_v5, 0 }
  0x13   : > { %2275 = vmatpush3.bf16.xpose.msra.mxu0 %v564_v3  ;;  %2281 = vmatpush3.bf16.xpose.msra.mxu1 %v621_v4  ;;  %v735_v10 = vsel %vm520_vm0, %v2405_v6, 0  ;;  %v2627_v11 = vld [vmem:[%s425_s28 + $0x10] sm:$0xff]   ;;  %v2630_v12 = vld [vmem:[%s425_s28 + $0x18] sm:$0xff]   ;;  %517 = vst.msk [vmem:[#allocation3 + $0x28] sm:$0xff] %vm503_vm2, %v2524_v0  ;;  %518 = vst.msk [vmem:[#allocation3 + $0x30] sm:$0xff] %vm503_vm2, %v2524_v0 }
  0x14   : > { %2286 = vmatprep.subr.bf16.mxu0 %v2524_v0  ;;  %2292 = vmatprep.subr.bf16.mxu1 %v2524_v0  ;;  %519 = vst.msk [vmem:[#allocation3 + $0x38] sm:$0xff] %vm503_vm2, %v2524_v0  ;;  %v2704_v59 = vld [vmem:[#allocation2] sm:$0xff]  ;;  %v2706_v60 = vld [vmem:[#allocation2 + $0x10] sm:$0xff]  ;;  %v2714_v2 = vld [vmem:[#allocation2 + $0x8] sm:$0xff] }
  0x15   : > { %v2721_v4 = vld [vmem:[#allocation2 + $0x18] sm:$0xff]  ;;  %v2734_v14 = vld [vmem:[#allocation2 + $0x20] sm:$0xff] }
  0x1a   : > { %2277 = vmatmul.mubr.msk.bf16.vlgmr.msra.gmra.mrb[0].mxu0 %vm520_vm0, %v2612_v7  ;;  %2283 = vmatmul.mubr.msk.bf16.vlgmr.msra.gmra.mrb[0].mxu1 %vm520_vm0, %v2614_v8 }
  0x1b   : > { %2287 = vmatpush3.bf16.xpose.msra.mxu0 %v678_v9  ;;  %2293 = vmatpush3.bf16.xpose.msra.mxu1 %v735_v10 }
  0x1c   : > { %2288 = vmatprep.mubr.msk.bf16.mxu0 %vm2525_vm1, %v2524_v0  ;;  %2294 = vmatprep.mubr.msk.bf16.mxu1 %vm2525_vm1, %v2524_v0 }
  0x1d   : > { %2298 = vmatprep.subr.bf16.mxu0 %v2524_v0  ;;  %2304 = vmatprep.subr.bf16.mxu1 %v2524_v0 }
  0x22   : > { %2289 = vmatmul.mubr.msk.bf16.vlgmr.msra.gmra.mrb[4].mxu0 %vm520_vm0, %v2627_v11  ;;  %2295 = vmatmul.mubr.msk.bf16.vlgmr.msra.gmra.mrb[4].mxu1 %vm520_vm0, %v2630_v12 }
  0x23   : > { %2300 = vmatprep.mubr.msk.bf16.mxu0 %vm2525_vm1, %v2524_v0  ;;  %2306 = vmatprep.mubr.msk.bf16.mxu1 %vm2525_vm1, %v2524_v0 }
  0xed   : > { %v600_v18 = vpop.f32.mrb[0].mxu0  ;;  %v657_v20 = vpop.f32.mrb[0].mxu1 }
  0xee   : > { %v778_v19 = vmul.f32 0.17677669, %v600_v18  ;;  %v2278_v21 = vpop.f32.mrb[1].mxu0  ;;  %v780_v22 = vmul.f32 0.17677669, %v657_v20  ;;  %v2284_v23 = vpop.f32.mrb[1].mxu1 }
  0xef   : > { %v603_v24 = vpop.f32.mrb[2].mxu0  ;;  %v660_v26 = vpop.f32.mrb[2].mxu1  ;;  %v2745_v18 = vld [vmem:[#allocation2 + $0x28] sm:$0xff]  ;;  %v2750_v21 = vld [vmem:[#allocation2 + $0x30] sm:$0xff] }
  0xf0   : > { %v779_v25 = vmul.f32 0.17677669, %v603_v24  ;;  %v2279_v27 = vpop.f32.mrb[3].mxu0  ;;  %v2665_v28 = vsel %vm798_vm3, %v778_v19, -1e+30  ;;  %v2285_v30 = vpop.f32.mrb[3].mxu1 }
  0xf1   : > { %v781_v29 = vmul.f32 0.17677669, %v660_v26  ;;  %v2668_v31 = vsel %vm798_vm3, %v780_v22, -1e+30  ;;  %v821_v32 = vsel %vm820_vm4, %v2665_v28, -inf }
  0xf2   : > { %v827_v33 = vsel %vm820_vm4, %v2668_v31, -inf  ;;  %822 = vmax.xlane.f32.xlu0 %v821_v32  ;;  %v2675_v34 = vsel %vm799_vm5, %v779_v25, -1e+30  ;;  %v2760_v25 = vld [vmem:[#allocation2 + $0x38] sm:$0xff] }
  0xf3   : > { %828 = vmax.xlane.f32.xlu1 %v827_v33  ;;  %v2678_v35 = vsel %vm799_vm5, %v781_v29, -1e+30  ;;  %v824_v36 = vsel %vm820_vm4, %v2675_v34, -inf }
  0xf4   : > { %v830_v38 = vsel %vm820_vm4, %v2678_v35, -inf }
  0xf5   : > { %v714_v37 = vpop.f32.mrb[4].mxu0  ;;  %v771_v41 = vpop.f32.mrb[4].mxu1 }
  0xf6   : > { %825 = vmax.xlane.f32.xlu0 %v824_v36  ;;  %v782_v39 = vmul.f32 0.17677669, %v714_v37  ;;  %v2290_v40 = vpop.f32.mrb[5].mxu0  ;;  %v784_v43 = vmul.f32 0.17677669, %v771_v41  ;;  %v2296_v44 = vpop.f32.mrb[5].mxu1 }
  0xf7   : > { %831 = vmax.xlane.f32.xlu1 %v830_v38  ;;  %v717_v42 = vpop.f32.mrb[6].mxu0  ;;  %v774_v47 = vpop.f32.mrb[6].mxu1  ;;  %v2408_v36 = vld [vmem:[%s2785_s6] sm:$0xff]   ;;  %v2409_v37 = vld [vmem:[%s2785_s6 + $0x8] sm:$0xff]  }
  0xf8   : > { %v783_v45 = vmul.f32 0.17677669, %v717_v42  ;;  %v2291_v46 = vpop.f32.mrb[7].mxu0  ;;  %v2685_v48 = vsel %vm798_vm3, %v782_v39, -1e+30  ;;  %v2297_v50 = vpop.f32.mrb[7].mxu1  ;;  %2299 = vmatpush3.bf16.msra.mxu0 %v2408_v36  ;;  %2305 = vmatpush3.bf16.msra.mxu1 %v2409_v37 }
  0xf9   : > { %v785_v49 = vmul.f32 0.17677669, %v774_v47  ;;  %v833_v51 = vsel %vm820_vm4, %v2685_v48, -inf  ;;  %v2690_v52 = vsel %vm798_vm3, %v784_v43, -1e+30  ;;  %2310 = vmatprep.subr.bf16.mxu0 %v2524_v0  ;;  %2316 = vmatprep.subr.bf16.mxu1 %v2524_v0 }
  0xfa   : > { %834 = vmax.xlane.f32.xlu0 %v833_v51  ;;  %v2693_v53 = vsel %vm799_vm5, %v783_v45, -1e+30  ;;  %v839_v55 = vsel %vm820_vm4, %v2690_v52, -inf  ;;  %v2412_v36 = vld [vmem:[%s3082_s3] sm:$0x1f]  }
  0xfb   : > { %v836_v54 = vsel %vm820_vm4, %v2693_v53, -inf  ;;  %v2700_v56 = vsel %vm799_vm5, %v785_v49, -1e+30 }
  0xfc   : > { %837 = vmax.xlane.f32.xlu1 %v836_v54  ;;  %v842_v57 = vsel %vm820_vm4, %v2700_v56, -inf }
  0xfe   : > { %840 = vmax.xlane.f32.xlu0 %v839_v55 }
 0x100   : > { %843 = vmax.xlane.f32.xlu1 %v842_v57 }
 0x17f   : > { %v823_v61 = vpop.xlane.xlu0 %822 }
 0x180   : > { %v829_v62 = vpop.xlane.xlu1 %828  ;;  %v2709_v63 = vmax.f32 %v2704_v59, %v823_v61 }
 0x181   : > { %v2712_v1 = vmax.f32 %v2706_v60, %v829_v62 }
 0x182   : > { %v853_v3 = vsub.f32 %v2704_v59, %v2709_v63  ;;  %1282 = vst.msk [vmem:[#allocation2] sm:$0xff] %vm503_vm2, %v2709_v63  ;;  %879 = vperm.xlu0 %2398, %v2709_v63  }
 0x183   : > { %v855_v5 = vsub.f32 %v2706_v60, %v2712_v1  ;;  %1284 = vst.msk [vmem:[#allocation2 + $0x10] sm:$0xff] %vm503_vm2, %v2712_v1  ;;  %889 = vperm.xlu1 %2399, %v2712_v1   ;;  %v826_v6 = vpop.xlane.xlu0 %825 }
 0x184   : > { %v832_v9 = vpop.xlane.xlu1 %831  ;;  %v2729_v10 = vmax.f32 %v2714_v2, %v826_v6 }
 0x185   : > { %v2732_v13 = vmax.f32 %v2721_v4, %v832_v9 }
 0x186   : > { %v854_v15 = vsub.f32 %v2714_v2, %v2729_v10  ;;  %1283 = vst.msk [vmem:[#allocation2 + $0x8] sm:$0xff] %vm503_vm2, %v2729_v10 }
 0x187   : > { %v856_v16 = vsub.f32 %v2721_v4, %v2732_v13  ;;  %1285 = vst.msk [vmem:[#allocation2 + $0x18] sm:$0xff] %vm503_vm2, %v2732_v13  ;;  %884 = vperm.xlu1 %2399, %v2729_v10   ;;  %v835_v17 = vpop.xlane.xlu0 %834 }
 0x188   : > { %v2748_v19 = vmax.f32 %v2734_v14, %v835_v17  ;;  %v2411_v17 = vld [vmem:[%s2785_s6 + $0x18] sm:$0xff]  }
 0x189   : > { %v838_v20 = vpop.xlane.xlu1 %837  ;;  %v867_v2 = vmul.f32 1.442695, %v856_v16 }
 0x18a   : > { %v857_v22 = vsub.f32 %v2734_v14, %v2748_v19  ;;  %1286 = vst.msk [vmem:[#allocation2 + $0x20] sm:$0xff] %vm503_vm2, %v2748_v19  ;;  %v2757_v23 = vmax.f32 %v2745_v18, %v838_v20 }
 0x18b   : > { %894 = vperm.xlu1 %2399, %v2732_v13   ;;  %v841_v24 = vpop.xlane.xlu0 %840 }
 0x18c   : > { %1287 = vst.msk [vmem:[#allocation2 + $0x28] sm:$0xff] %vm503_vm2, %v2757_v23  ;;  %v2767_v27 = vmax.f32 %v2750_v21, %v841_v24  ;;  %v869_v10 = vmul.f32 1.442695, %v857_v22  ;;  %v3085_v59 = vsub.f32 %v2745_v18, %v2757_v23 }
 0x18d   : > { %v844_v29 = vpop.xlane.xlu1 %843 }
 0x18e   : > { %1288 = vst.msk [vmem:[#allocation2 + $0x30] sm:$0xff] %vm503_vm2, %v2767_v27  ;;  %v2774_v32 = vmax.f32 %v2760_v25, %v844_v29  ;;  %v871_v63 = vmul.f32 1.442695, %v3085_v59  ;;  %v3086_v60 = vsub.f32 %v2750_v21, %v2767_v27 }
 0x18f   : > { %899 = vperm.xlu1 %2399, %v2748_v19  }
 0x190   : > { %1289 = vst.msk [vmem:[#allocation2 + $0x38] sm:$0xff] %vm503_vm2, %v2774_v32  ;;  %v873_v1 = vmul.f32 1.442695, %v3086_v60 }
 0x193   : > { %909 = vperm.xlu1 %2399, %v2767_v27  }
 0x197   : > { %904 = vperm.xlu1 %2399, %v2757_v23  }
 0x19b   : > { %914 = vperm.xlu1 %2399, %v2774_v32  }
 0x201   : > { %v880_v38 = vpop.permute.xlu0 %879 }
 0x202   : > { %v917_v39 = vsub.f32 %v2665_v28, %v880_v38  ;;  %v890_v40 = vpop.permute.xlu1 %889 }
 0x203   : > { %v919_v42 = vsub.f32 %v2668_v31, %v890_v40  ;;  %v2413_v40 = vld [vmem:[%s3082_s3 + $0x8] sm:$0x1f]  }
 0x204   : > { %v925_v41 = vmul.f32 1.442695, %v917_v39  ;;  %v1324_v39 = vsel %vm520_vm0, %v2412_v36, 0 }
 0x205   : > { %v929_v46 = vmul.f32 1.442695, %v919_v42 }
 0x206   : > { %v885_v43 = vpop.permute.xlu1 %884  ;;  %2420 = vpow2.f32 %v925_v41 }
 0x207   : > { %v918_v44 = vsub.f32 %v2675_v34, %v885_v43  ;;  %v2410_v34 = vld [vmem:[%s2785_s6 + $0x10] sm:$0xff]  }
 0x209   : > { %v927_v45 = vmul.f32 1.442695, %v918_v44  ;;  %v1381_v44 = vsel %vm520_vm0, %v2413_v40, 0 }
 0x20a   : > { %v895_v47 = vpop.permute.xlu1 %894 }
 0x20b   : > { %2422 = vpow2.f32 %v927_v45  ;;  %v920_v49 = vsub.f32 %v2678_v35, %v895_v47  ;;  %v2414_v45 = vld [vmem:[%s3082_s3 + $0x10] sm:$0x1f]   ;;  %v2415_v47 = vld [vmem:[%s3082_s3 + $0x18] sm:$0x1f]  }
 0x20c   : > { %2424 = vpow2.f32 %v929_v46  ;;  %v1438_v46 = vsel %vm520_vm0, %v2414_v45, 0 }
 0x20d   : > { %v931_v50 = vmul.f32 1.442695, %v920_v49  ;;  %v1495_v49 = vsel %vm520_vm0, %v2415_v47, 0 }
 0x20e   : > { %v900_v51 = vpop.permute.xlu1 %899 }
 0x20f   : > { %2426 = vpow2.f32 %v931_v50  ;;  %v921_v28 = vsub.f32 %v2685_v48, %v900_v51 }
 0x210   : > { %v2799_v31 = vpop.eup %2420 }
 0x211   : > { %v933_v57 = vmul.f32 1.442695, %v921_v28 }
 0x212   : > { %v910_v54 = vpop.permute.xlu1 %909 }
 0x213   : > { %v923_v58 = vsub.f32 %v2690_v52, %v910_v54  ;;  %2428 = vpow2.f32 %v933_v57 }
 0x215   : > { %v2801_v55 = vpop.eup %2422  ;;  %v937_v52 = vmul.f32 1.442695, %v923_v58 }
 0x216   : > { %v905_v61 = vpop.permute.xlu1 %904  ;;  %v1054_v35 = vpack.c.bf16 %v2801_v55, %v2799_v31  ;;  %v2808_v6 = vpop.eup %2424 }
 0x217   : > { %v922_v62 = vsub.f32 %v2693_v53, %v905_v61 }
 0x218   : > { %2301 = vmatmul.mubr.msk.bf16.vlgmr.msra.gmra.mrb[8].mxu0 %vm820_vm4, %v1054_v35 }
 0x219   : > { %v2811_v48 = vpop.eup %2426  ;;  %v935_v9 = vmul.f32 1.442695, %v922_v62  ;;  %2311 = vmatpush3.bf16.msra.mxu0 %v2410_v34  ;;  %2312 = vmatprep.mubr.msk.bf16.mxu0 %vm2525_vm1, %v2524_v0 }
 0x21a   : > { %v915_v20 = vpop.permute.xlu1 %914  ;;  %v1055_v24 = vpack.c.bf16 %v2811_v48, %v2808_v6  ;;  %2322 = vmatprep.subr.bf16.mxu0 %v2524_v0 }
 0x21b   : > { %2430 = vpow2.f32 %v935_v9  ;;  %v924_v53 = vsub.f32 %v2700_v56, %v915_v20 }
 0x21c   : > { %2307 = vmatmul.mubr.msk.bf16.vlgmr.msra.gmra.mrb[8].mxu1 %vm820_vm4, %v1055_v24  ;;  %2432 = vpow2.f32 %v937_v52 }
 0x21d   : > { %v939_v29 = vmul.f32 1.442695, %v924_v53  ;;  %2317 = vmatpush3.bf16.msra.mxu1 %v2411_v17  ;;  %2318 = vmatprep.mubr.msk.bf16.mxu1 %vm2525_vm1, %v2524_v0  ;;  %v2827_v37 = vpop.eup %2428 }
 0x21e   : > { %2328 = vmatprep.subr.bf16.mxu1 %v2524_v0 }
 0x21f   : > { %2434 = vpow2.f32 %v939_v29 }
 0x225   : > { %v2829_v38 = vpop.eup %2430 }
 0x226   : > { %v1056_v56 = vpack.c.bf16 %v2829_v38, %v2827_v37  ;;  %v2837_v41 = vpop.eup %2432 }
 0x228   : > { %2313 = vmatmul.mubr.msk.bf16.vlgmr.msra.gmra.mrb[12].mxu0 %vm820_vm4, %v1056_v56 }
 0x229   : > { %v2840_v42 = vpop.eup %2434  ;;  %2323 = vmatpush3.bf16.xpose.msra.mxu0 %v1324_v39  ;;  %2324 = vmatprep.mubr.msk.bf16.mxu0 %vm2525_vm1, %v2524_v0 }
 0x22a   : > { %v1057_v43 = vpack.c.bf16 %v2840_v42, %v2837_v41  ;;  %2334 = vmatprep.subr.bf16.mxu0 %v2524_v0 }
 0x22c   : > { %2319 = vmatmul.mubr.msk.bf16.vlgmr.msra.gmra.mrb[12].mxu1 %vm820_vm4, %v1057_v43 }
 0x22d   : > { %2329 = vmatpush3.bf16.xpose.msra.mxu1 %v1381_v44  ;;  %2330 = vmatprep.mubr.msk.bf16.mxu1 %vm2525_vm1, %v2524_v0 }
 0x22e   : > { %2340 = vmatprep.subr.bf16.mxu1 %v2524_v0 }
 0x230   : > { %2325 = vmatmul.mubr.msk.bf16.vlgmr.msra.gmra.mrb[16].mxu0 %vm520_vm0, %v2612_v7 }
 0x231   : > { %2335 = vmatpush3.bf16.xpose.msra.mxu0 %v1438_v46  ;;  %2336 = vmatprep.mubr.msk.bf16.mxu0 %vm2525_vm1, %v2524_v0 }
 0x232   : > { %2346 = vmatprep.subr.bf16.mxu0 %v2524_v0 }
 0x234   : > { %2331 = vmatmul.mubr.msk.bf16.vlgmr.msra.gmra.mrb[16].mxu1 %vm520_vm0, %v2614_v8 }
 0x235   : > { %2341 = vmatpush3.bf16.xpose.msra.mxu1 %v1495_v49  ;;  %2342 = vmatprep.mubr.msk.bf16.mxu1 %vm2525_vm1, %v2524_v0 }
 0x236   : > { %2352 = vmatprep.subr.bf16.mxu1 %v2524_v0 }
 0x238   : > { %2337 = vmatmul.mubr.msk.bf16.vlgmr.msra.gmra.mrb[20].mxu0 %vm520_vm0, %v2627_v11 }
 0x239   : > { %2348 = vmatprep.mubr.msk.bf16.mxu0 %vm2525_vm1, %v2524_v0 }
 0x23c   : > { %2343 = vmatmul.mubr.msk.bf16.vlgmr.msra.gmra.mrb[20].mxu1 %vm520_vm0, %v2630_v12 }
 0x23d   : > { %2354 = vmatprep.mubr.msk.bf16.mxu1 %vm2525_vm1, %v2524_v0 }
 0x2eb   : > { %v2878_v7 = vpop.f32.mrb[8].mxu0 }
 0x2ec   : > { %v2302_v8 = vpop.f32.mrb[9].mxu0 }
 0x2ed   : > { %v2880_v50 = vpop.f32.mrb[10].mxu0 }
 0x2ee   : > { %v2303_v51 = vpop.f32.mrb[11].mxu0 }
 0x2ef   : > { %v2882_v28 = vpop.f32.mrb[8].mxu1 }
 0x2f0   : > { %v2308_v54 = vpop.f32.mrb[9].mxu1 }
 0x2f1   : > { %v2884_v34 = vpop.f32.mrb[10].mxu1 }
 0x2f2   : > { %v2309_v11 = vpop.f32.mrb[11].mxu1 }
 0x2fb   : > { %v2886_v57 = vpop.f32.mrb[12].mxu0 }
 0x2fc   : > { %v2314_v58 = vpop.f32.mrb[13].mxu0 }
 0x2fd   : > { %v2888_v61 = vpop.f32.mrb[14].mxu0 }
 0x2fe   : > { %v2315_v12 = vpop.f32.mrb[15].mxu0 }
 0x2ff   : > { %v2890_v35 = vpop.f32.mrb[12].mxu1 }
 0x300   : > { %v2320_v62 = vpop.f32.mrb[13].mxu1 }
 0x301   : > { %v2892_v9 = vpop.f32.mrb[14].mxu1 }
 0x302   : > { %v2321_v17 = vpop.f32.mrb[15].mxu1 }
 0x303   : > { %v1360_v52 = vpop.f32.mrb[16].mxu0 }
 0x304   : > { %v1538_v20 = vmul.f32 0.17677669, %v1360_v52  ;;  %v2326_v24 = vpop.f32.mrb[17].mxu0 }
 0x305   : > { %v1363_v53 = vpop.f32.mrb[18].mxu0 }
 0x306   : > { %v1547_v29 = vsel %vm1546_vm6, %v1538_v20, -inf  ;;  %v2327_v36 = vpop.f32.mrb[19].mxu0  ;;  %v1539_v44 = vmul.f32 0.17677669, %v1363_v53 }
 0x307   : > { %v1417_v56 = vpop.f32.mrb[16].mxu1  ;;  %1548 = vmax.xlane.f32.xlu1 %v1547_v29 }
 0x308   : > { %v1540_v39 = vmul.f32 0.17677669, %v1417_v56  ;;  %v2332_v40 = vpop.f32.mrb[17].mxu1  ;;  %v1550_v12 = vsel %vm1546_vm6, %v1539_v44, -inf }
 0x309   : > { %v1420_v43 = vpop.f32.mrb[18].mxu1 }
 0x30a   : > { %v1541_v45 = vmul.f32 0.17677669, %v1420_v43  ;;  %v2333_v46 = vpop.f32.mrb[19].mxu1  ;;  %v1553_v47 = vsel %vm1546_vm6, %v1540_v39, -inf }
 0x30b   : > { %1554 = vmax.xlane.f32.xlu0 %v1553_v47  ;;  %v1474_v49 = vpop.f32.mrb[20].mxu0 }
 0x30c   : > { %v1542_v8 = vmul.f32 0.17677669, %v1474_v49  ;;  %v2338_v51 = vpop.f32.mrb[21].mxu0  ;;  %v1556_v54 = vsel %vm1546_vm6, %v1541_v45, -inf }
 0x30d   : > { %1557 = vmax.xlane.f32.xlu1 %v1556_v54  ;;  %v1477_v11 = vpop.f32.mrb[22].mxu0 }
 0x30e   : > { %v1543_v58 = vmul.f32 0.17677669, %v1477_v11  ;;  %v2339_v62 = vpop.f32.mrb[23].mxu0  ;;  %v1559_v29 = vsel %vm1546_vm6, %v1542_v8, -inf }
 0x30f   : > { %v1531_v17 = vpop.f32.mrb[20].mxu1  ;;  %1551 = vmax.xlane.f32.xlu0 %v1550_v12 }
 0x310   : > { %v1544_v52 = vmul.f32 0.17677669, %v1531_v17  ;;  %v2344_v24 = vpop.f32.mrb[21].mxu1  ;;  %v1562_v53 = vsel %vm1546_vm6, %v1543_v58, -inf }
 0x311   : > { %v1534_v36 = vpop.f32.mrb[22].mxu1  ;;  %1563 = vmax.xlane.f32.xlu1 %v1562_v53 }
 0x312   : > { %v1545_v56 = vmul.f32 0.17677669, %v1534_v36  ;;  %v2345_v40 = vpop.f32.mrb[23].mxu1  ;;  %v1565_v46 = vsel %vm1546_vm6, %v1544_v52, -inf }
 0x313   : > { %1560 = vmax.xlane.f32.xlu0 %v1559_v29 }
 0x314   : > { %v1568_v43 = vsel %vm1546_vm6, %v1545_v56, -inf }
 0x315   : > { %1569 = vmax.xlane.f32.xlu1 %v1568_v43 }
 0x317   : > { %1566 = vmax.xlane.f32.xlu0 %v1565_v46 }
 0x394   : > { %v1549_v47 = vpop.xlane.xlu1 %1548 }
 0x395   : > { %v1571_v49 = vsub.f32 %v1538_v20, %v1549_v47 }
 0x397   : > { %v1579_v51 = vmul.f32 1.442695, %v1571_v49 }
 0x398   : > { %v1555_v54 = vpop.xlane.xlu0 %1554 }
 0x399   : > { %2436 = vpow2.f32 %v1579_v51  ;;  %v1573_v11 = vsub.f32 %v1540_v39, %v1555_v54 }
 0x39a   : > { %v1558_v12 = vpop.xlane.xlu1 %1557 }
 0x39b   : > { %v1583_v62 = vmul.f32 1.442695, %v1573_v11  ;;  %v1574_v17 = vsub.f32 %v1541_v45, %v1558_v12 }
 0x39c   : > { %v1552_v24 = vpop.xlane.xlu0 %1551 }
 0x39d   : > { %2438 = vpow2.f32 %v1583_v62  ;;  %v1572_v53 = vsub.f32 %v1539_v44, %v1552_v24  ;;  %v1585_v29 = vmul.f32 1.442695, %v1574_v17 }
 0x39e   : > { %v1564_v36 = vpop.xlane.xlu1 %1563 }
 0x39f   : > { %v1581_v40 = vmul.f32 1.442695, %v1572_v53  ;;  %v1576_v33 = vsub.f32 %v1543_v58, %v1564_v36 }
 0x3a0   : > { %v1561_v30 = vpop.xlane.xlu0 %1560 }
 0x3a1   : > { %2440 = vpow2.f32 %v1581_v40  ;;  %v1575_v43 = vsub.f32 %v1542_v8, %v1561_v30  ;;  %v1589_v20 = vmul.f32 1.442695, %v1576_v33 }
 0x3a2   : > { %v1570_v46 = vpop.xlane.xlu1 %1569  ;;  %2442 = vpow2.f32 %v1585_v29  ;;  %v957_v29 = vsel %vm820_vm4, %v2799_v31, 0.0  ;;  %v975_v31 = vsel %vm820_vm4, %v2837_v41, 0.0 }
 0x3a3   : > { %v2902_v26 = vpop.eup %2436  ;;  %v1587_v47 = vmul.f32 1.442695, %v1575_v43  ;;  %v1578_v39 = vsub.f32 %v1545_v56, %v1570_v46  ;;  %v963_v43 = vsel %vm820_vm4, %v2808_v6, 0.0  ;;  %v960_v46 = vsel %vm820_vm4, %v2801_v55, 0.0  ;;  %v2416_v55 = vld [vmem:[%s3083_s4] sm:$0x1f]  }
 0x3a4   : > { %v1567_v49 = vpop.xlane.xlu0 %1566  ;;  %v1595_v45 = vsel %vm1546_vm6, %v2902_v26, 0.0  ;;  %v1649_v6 = vsel %vm1647_vm7, %v2416_v55, 0 }
 0x3a5   : > { %2444 = vpow2.f32 %v1587_v47  ;;  %v1577_v44 = vsub.f32 %v1544_v52, %v1567_v49  ;;  %1596 = vadd.xlane.f32.xlu0 %v1595_v45  ;;  %v1593_v58 = vmul.f32 1.442695, %v1578_v39  ;;  %v966_v47 = vsel %vm820_vm4, %v2811_v48, 0.0  ;;  %2347 = vmatpush3.bf16.msra.mxu0 %v1649_v6 }
 0x3a6   : > { %2446 = vpow2.f32 %v1589_v20  ;;  %v969_v20 = vsel %vm820_vm4, %v2827_v37, 0.0  ;;  %v972_v39 = vsel %vm820_vm4, %v2829_v38, 0.0  ;;  %v978_v48 = vsel %vm820_vm4, %v2840_v42, 0.0  ;;  %v2417_v37 = vld [vmem:[%s3083_s4 + $0x8] sm:$0x1f]   ;;  %2358 = vmatprep.subr.bf16.mxu0 %v2524_v0 }
 0x3a7   : > { %v2906_v51 = vpop.eup %2438  ;;  %v1591_v54 = vmul.f32 1.442695, %v1577_v44  ;;  %v863_v38 = vmul.f32 1.442695, %v854_v15  ;;  %v1701_v41 = vsel %vm1647_vm7, %v2417_v37, 0 }
 0x3a8   : > { %v1601_v30 = vsel %vm1546_vm6, %v2906_v51, 0.0  ;;  %v861_v49 = vmul.f32 1.442695, %v853_v3  ;;  %2353 = vmatpush3.bf16.msra.mxu1 %v1701_v41  ;;  %v865_v42 = vmul.f32 1.442695, %v855_v5  ;;  %v3087_v3 = vsub.f32 %v2760_v25, %v2774_v32  ;;  %v944_v41 = vld [vmem:[#allocation3 + $0x18] sm:$0xff] }
 0x3a9   : > { %2448 = vpow2.f32 %v1591_v54  ;;  %1602 = vadd.xlane.f32.xlu0 %v1601_v30  ;;  %2364 = vmatprep.subr.bf16.mxu1 %v2524_v0  ;;  %v2418_v30 = vld [vmem:[%s3083_s4 + $0x10] sm:$0x1f]  }
 0x3aa   : > { %2450 = vpow2.f32 %v1593_v58  ;;  %v875_v4 = vmul.f32 1.442695, %v3087_v3  ;;  %v941_v58 = vld [vmem:[#allocation3] sm:$0xff] }
 0x3ab   : > { %v2910_v33 = vpop.eup %2440  ;;  %2452 = vpow2.f32 %v863_v38  ;;  %v945_v38 = vld [vmem:[#allocation3 + $0x20] sm:$0xff] }
 0x3ac   : > { %v1598_v8 = vsel %vm1546_vm6, %v2910_v33, 0.0  ;;  %v2914_v56 = vpop.eup %2442  ;;  %2454 = vpow2.f32 %v861_v49 }
 0x3ad   : > { %1599 = vadd.xlane.f32.xlu1 %v1598_v8  ;;  %v1604_v12 = vsel %vm1546_vm6, %v2914_v56, 0.0  ;;  %2456 = vpow2.f32 %v865_v42 }
 0x3ae   : > { %2458 = vpow2.f32 %v867_v2 }
 0x3af   : > { %v2916_v52 = vpop.eup %2444  ;;  %2460 = vpow2.f32 %v869_v10 }
 0x3b0   : > { %v1607_v11 = vsel %vm1546_vm6, %v2916_v52, 0.0  ;;  %v2922_v62 = vpop.eup %2446  ;;  %2462 = vpow2.f32 %v871_v63 }
 0x3b1   : > { %1608 = vadd.xlane.f32.xlu0 %v1607_v11  ;;  %1605 = vadd.xlane.f32.xlu1 %v1604_v12  ;;  %v1610_v53 = vsel %vm1546_vm6, %v2922_v62, 0.0  ;;  %2464 = vpow2.f32 %v873_v1 }
 0x3b2   : > { %2466 = vpow2.f32 %v875_v4  ;;  %v947_v4 = vld [vmem:[#allocation3 + $0x30] sm:$0xff] }
 0x3b3   : > { %v2924_v17 = vpop.eup %2448 }
 0x3b4   : > { %v1613_v24 = vsel %vm1546_vm6, %v2924_v17, 0.0  ;;  %v2930_v36 = vpop.eup %2450 }
 0x3b5   : > { %1614 = vadd.xlane.f32.xlu0 %v1613_v24  ;;  %1611 = vadd.xlane.f32.xlu1 %v1610_v53  ;;  %v1616_v40 = vsel %vm1546_vm6, %v2930_v36, 0.0  ;;  %v2453_v5 = vpop.eup %2452 }
 0x3b6   : > { %v2455_v13 = vpop.eup %2454 }
 0x3b7   : > { %v2457_v14 = vpop.eup %2456  ;;  %v949_v11 = vmul.f32 %v2455_v13, %v941_v58 }
 0x3b8   : > { %v2984_v15 = vpop.eup %2458 }
 0x3b9   : > { %958 = vadd.xlane.f32.xlu0 %v957_v29  ;;  %1617 = vadd.xlane.f32.xlu1 %v1616_v40  ;;  %v2461_v16 = vpop.eup %2460  ;;  %v943_v40 = vld [vmem:[#allocation3 + $0x10] sm:$0xff]  ;;  %v952_v60 = vmul.f32 %v2984_v15, %v944_v41 }
 0x3ba   : > { %v2987_v18 = vpop.eup %2462 }
 0x3bb   : > { %v2990_v19 = vpop.eup %2464 }
 0x3bc   : > { %v2992_v21 = vpop.eup %2466 }
 0x3bd   : > { %964 = vadd.xlane.f32.xlu0 %v963_v43  ;;  %961 = vadd.xlane.f32.xlu1 %v960_v46  ;;  %v942_v43 = vld [vmem:[#allocation3 + $0x8] sm:$0xff] }
 0x3be   : > { %v950_v55 = vmul.f32 %v2453_v5, %v942_v43 }
 0x3c1   : > { %970 = vadd.xlane.f32.xlu0 %v969_v20  ;;  %967 = vadd.xlane.f32.xlu1 %v966_v47 }
 0x3c5   : > { %976 = vadd.xlane.f32.xlu0 %v975_v31  ;;  %973 = vadd.xlane.f32.xlu1 %v972_v39  ;;  %v1753_v31 = vsel %vm1647_vm7, %v2418_v30, 0  ;;  %v951_v39 = vmul.f32 %v2457_v14, %v943_v40 }
 0x3c9   : > { %979 = vadd.xlane.f32.xlu1 %v978_v48 }
 0x3da   : > { %1013 = vperm.xlu1 %2399, %v2453_v5   ;;  %v946_v5 = vld [vmem:[#allocation3 + $0x28] sm:$0xff] }
 0x3db   : > { %1008 = vperm.xlu0 %2398, %v2455_v13  }
 0x3de   : > { %1018 = vperm.xlu1 %2399, %v2457_v14  }
 0x3df   : > { %1023 = vperm.xlu0 %2398, %v2984_v15  }
 0x3e2   : > { %1028 = vperm.xlu1 %2399, %v2461_v16  }
 0x3e3   : > { %1033 = vperm.xlu0 %2398, %v2987_v18  }
 0x3e6   : > { %1038 = vperm.xlu1 %2399, %v2990_v19  }
 0x3e7   : > { %1043 = vperm.xlu0 %2398, %v2992_v21  }
 0x432   : > { %v1597_v22 = vpop.xlane.xlu0 %1596 }
 0x433   : > { %2468 = vrcp.f32 %v1597_v22 }
 0x436   : > { %v1603_v23 = vpop.xlane.xlu0 %1602 }
 0x43a   : > { %v1600_v25 = vpop.xlane.xlu1 %1599 }
 0x43b   : > { %2470 = vrcp.f32 %v1600_v25 }
 0x43c   : > { %2472 = vrcp.f32 %v1603_v23 }
 0x43d   : > { %v2469_v54 = vpop.eup %2468 }
 0x43e   : > { %v1609_v27 = vpop.xlane.xlu0 %1608  ;;  %v1606_v32 = vpop.xlane.xlu1 %1605  ;;  %v1627_v12 = vmul.f32 %v2469_v54, %v2902_v26  ;;  %v2419_v26 = vld [vmem:[%s3083_s4 + $0x18] sm:$0x1f]  }
 0x43f   : > { %2474 = vrcp.f32 %v1606_v32  ;;  %v1805_v63 = vsel %vm1647_vm7, %v2419_v26, 0  ;;  %v948_v54 = vld [vmem:[#allocation3 + $0x38] sm:$0xff] }
 0x440   : > { %2476 = vrcp.f32 %v1609_v27  ;;  %v955_v27 = vmul.f32 %v2990_v19, %v947_v4  ;;  %v998_v19 = vld [vmem:[#allocation4] sm:$0xff]  ;;  %v1004_v4 = vld [vmem:[#allocation4 + $0x30] sm:$0xff] }
 0x442   : > { %v1615_v45 = vpop.xlane.xlu0 %1614  ;;  %v1612_v44 = vpop.xlane.xlu1 %1611 }
 0x443   : > { %2478 = vrcp.f32 %v1612_v44 }
 0x444   : > { %2480 = vrcp.f32 %v1615_v45 }
 0x445   : > { %v2471_v8 = vpop.eup %2470 }
 0x446   : > { %v1628_v24 = vmul.f32 %v2471_v8, %v2910_v33  ;;  %v959_v53 = vpop.xlane.xlu0 %958  ;;  %v1618_v29 = vpop.xlane.xlu1 %1617 }
 0x447   : > { %v2473_v46 = vpop.eup %2472  ;;  %v981_v20 = vadd.f32 %v959_v53, %v949_v11  ;;  %2482 = vrcp.f32 %v1618_v29 }
 0x448   : > { %v1635_v47 = vpack.c.bf16 %v1628_v24, %v1627_v12  ;;  %v1629_v33 = vmul.f32 %v2473_v46, %v2906_v51  ;;  %v953_v51 = vmul.f32 %v2461_v16, %v945_v38  ;;  %v999_v24 = vld [vmem:[#allocation4 + $0x8] sm:$0xff] }
 0x449   : > { %990 = vst.msk [vmem:[#allocation3] sm:$0xff] %vm503_vm2, %v981_v20  ;;  %v2475_v6 = vpop.eup %2474 }
 0x44a   : > { %v965_v48 = vpop.xlane.xlu0 %964  ;;  %2349 = vmatmul.mubr.msk.bf16.vlgmr.msra.gmra.mrb[24].mxu0 %vm1546_vm6, %v1635_v47  ;;  %v962_v37 = vpop.xlane.xlu1 %961  ;;  %v1630_v49 = vmul.f32 %v2475_v6, %v2914_v56 }
 0x44b   : > { %v983_v42 = vadd.f32 %v965_v48, %v951_v39  ;;  %v982_v2 = vadd.f32 %v962_v37, %v950_v55  ;;  %2359 = vmatpush3.bf16.msra.mxu0 %v1753_v31  ;;  %2360 = vmatprep.mubr.msk.bf16.mxu0 %vm2525_vm1, %v2524_v0  ;;  %v2477_v10 = vpop.eup %2476  ;;  %v1000_v31 = vld [vmem:[#allocation4 + $0x10] sm:$0xff] }
 0x44c   : > { %v1636_v59 = vpack.c.bf16 %v1630_v49, %v1629_v33  ;;  %v1631_v14 = vmul.f32 %v2477_v10, %v2916_v52  ;;  %v954_v52 = vmul.f32 %v2987_v18, %v946_v5  ;;  %v956_v18 = vmul.f32 %v2992_v21, %v948_v54  ;;  %v1001_v21 = vld [vmem:[#allocation4 + $0x18] sm:$0xff] }
 0x44d   : > { %992 = vst.msk [vmem:[#allocation3 + $0x10] sm:$0xff] %vm503_vm2, %v983_v42  ;;  %991 = vst.msk [vmem:[#allocation3 + $0x8] sm:$0xff] %vm503_vm2, %v982_v2  ;;  %v2479_v1 = vpop.eup %2478  ;;  %v1003_v42 = vld [vmem:[#allocation4 + $0x28] sm:$0xff]  ;;  %v1002_v2 = vld [vmem:[#allocation4 + $0x20] sm:$0xff] }
 0x44e   : > { %v971_v3 = vpop.xlane.xlu0 %970  ;;  %v968_v56 = vpop.xlane.xlu1 %967  ;;  %v1632_v22 = vmul.f32 %v2479_v1, %v2922_v62  ;;  %2355 = vmatmul.mubr.msk.bf16.vlgmr.msra.gmra.mrb[24].mxu1 %vm1546_vm6, %v1636_v59 }
 0x44f   : > { %v2481_v13 = vpop.eup %2480  ;;  %v985_v23 = vadd.f32 %v971_v3, %v953_v51  ;;  %v984_v25 = vadd.f32 %v968_v56, %v952_v60  ;;  %2365 = vmatpush3.bf16.msra.mxu1 %v1805_v63  ;;  %2366 = vmatprep.mubr.msk.bf16.mxu1 %vm2525_vm1, %v2524_v0  ;;  %v1005_v56 = vld [vmem:[#allocation4 + $0x38] sm:$0xff] }
 0x450   : > { %v1856_v16 = vld [vmem:[#allocation3] sm:$0xff]  ;;  %v1637_v32 = vpack.c.bf16 %v1632_v22, %v1631_v14  ;;  %v1633_v62 = vmul.f32 %v2481_v13, %v2924_v17 }
 0x451   : > { %v2483_v15 = vpop.eup %2482  ;;  %994 = vst.msk [vmem:[#allocation3 + $0x20] sm:$0xff] %vm503_vm2, %v985_v23  ;;  %993 = vst.msk [vmem:[#allocation3 + $0x18] sm:$0xff] %vm503_vm2, %v984_v25  ;;  %2484 = vrcp.f32 %v1856_v16 }
 0x452   : > { %v1634_v45 = vmul.f32 %v2483_v15, %v2930_v36  ;;  %v977_v44 = vpop.xlane.xlu0 %976  ;;  %v974_v58 = vpop.xlane.xlu1 %973  ;;  %2361 = vmatmul.mubr.msk.bf16.vlgmr.msra.gmra.mrb[28].mxu0 %vm1546_vm6, %v1637_v32 }
 0x453   : > { %v987_v0 = vadd.f32 %v977_v44, %v955_v27  ;;  %v986_v30 = vadd.f32 %v974_v58, %v954_v52 }
 0x454   : > { %v1638_v8 = vpack.c.bf16 %v1634_v45, %v1633_v62  ;;  %v1858_v11 = vld [vmem:[#allocation3 + $0x10] sm:$0xff]  ;;  %v1857_v12 = vld [vmem:[#allocation3 + $0x8] sm:$0xff] }
 0x455   : > { %996 = vst.msk [vmem:[#allocation3 + $0x30] sm:$0xff] %vm503_vm2, %v987_v0  ;;  %995 = vst.msk [vmem:[#allocation3 + $0x28] sm:$0xff] %vm503_vm2, %v986_v30  ;;  %2486 = vrcp.f32 %v1858_v11 }
 0x456   : > { %v980_v17 = vpop.xlane.xlu1 %979  ;;  %2488 = vrcp.f32 %v1857_v12  ;;  %2367 = vmatmul.mubr.msk.bf16.vlgmr.msra.gmra.mrb[28].mxu1 %vm1546_vm6, %v1638_v8 }
 0x457   : > { %v988_v36 = vadd.f32 %v980_v17, %v956_v18 }
 0x458   : > { %v1860_v53 = vld [vmem:[#allocation3 + $0x20] sm:$0xff]  ;;  %v1859_v29 = vld [vmem:[#allocation3 + $0x18] sm:$0xff] }
 0x459   : > { %997 = vst.msk [vmem:[#allocation3 + $0x38] sm:$0xff] %vm503_vm2, %v988_v36  ;;  %2490 = vrcp.f32 %v1860_v53 }
 0x45a   : > { %v1009_v40 = vpop.permute.xlu0 %1008  ;;  %v1014_v43 = vpop.permute.xlu1 %1013  ;;  %2492 = vrcp.f32 %v1859_v29 }
 0x45b   : > { %v2485_v46 = vpop.eup %2484  ;;  %v1046_v20 = vmul.f32 %v1009_v40, %v998_v19  ;;  %v1047_v47 = vmul.f32 %v1014_v43, %v999_v24 }
 0x45c   : > { %1874 = vperm.xlu1 %2399, %v2485_v46   ;;  %v1862_v39 = vld [vmem:[#allocation3 + $0x30] sm:$0xff]  ;;  %v1861_v55 = vld [vmem:[#allocation3 + $0x28] sm:$0xff] }
 0x45d   : > { %v1266_v26 = vadd.f32 %v2878_v7, %v1046_v20  ;;  %v1267_v6 = vadd.f32 %v2880_v50, %v1047_v47  ;;  %2494 = vrcp.f32 %v1862_v39 }
 0x45e   : > { %v1024_v33 = vpop.permute.xlu0 %1023  ;;  %v1019_v48 = vpop.permute.xlu1 %1018  ;;  %2496 = vrcp.f32 %v1861_v55 }
 0x45f   : > { %v2487_v37 = vpop.eup %2486  ;;  %1274 = vst.msk [vmem:[#allocation4] sm:$0xff] %vm520_vm0, %v1266_v26  ;;  %1275 = vst.msk [vmem:[#allocation4 + $0x8] sm:$0xff] %vm520_vm0, %v1267_v6  ;;  %v1049_v38 = vmul.f32 %v1024_v33, %v1001_v21  ;;  %v1048_v41 = vmul.f32 %v1019_v48, %v1000_v31 }
 0x460   : > { %v2489_v49 = vpop.eup %2488  ;;  %1884 = vperm.xlu1 %2399, %v2487_v37   ;;  %v1863_v10 = vld [vmem:[#allocation3 + $0x38] sm:$0xff] }
 0x461   : > { %v1269_v7 = vadd.f32 %v2884_v34, %v1049_v38  ;;  %v1268_v50 = vadd.f32 %v2882_v28, %v1048_v41  ;;  %1879 = vperm.xlu0 %2398, %v2489_v49   ;;  %2498 = vrcp.f32 %v1863_v10 }
 0x462   : > { %v1034_v51 = vpop.permute.xlu0 %1033  ;;  %v1029_v59 = vpop.permute.xlu1 %1028 }
 0x463   : > { %v2491_v63 = vpop.eup %2490  ;;  %1277 = vst.msk [vmem:[#allocation4 + $0x18] sm:$0xff] %vm520_vm0, %v1269_v7  ;;  %1276 = vst.msk [vmem:[#allocation4 + $0x10] sm:$0xff] %vm520_vm0, %v1268_v50  ;;  %v1051_v60 = vmul.f32 %v1034_v51, %v1003_v42  ;;  %v1050_v1 = vmul.f32 %v1029_v59, %v1002_v2 }
 0x464   : > { %v2493_v3 = vpop.eup %2492  ;;  %1894 = vperm.xlu1 %2399, %v2491_v63  }
 0x465   : > { %v1271_v5 = vadd.f32 %v2888_v61, %v1051_v60  ;;  %v1270_v34 = vadd.f32 %v2886_v57, %v1050_v1  ;;  %1889 = vperm.xlu0 %2398, %v2493_v3  }
 0x466   : > { %v1044_v28 = vpop.permute.xlu0 %1043  ;;  %v1039_v13 = vpop.permute.xlu1 %1038  ;;  %v1848_v52 = vld [vmem:[#allocation4] sm:$0xff]  ;;  %v1849_v44 = vld [vmem:[#allocation4 + $0x8] sm:$0xff] }
 0x467   : > { %v2495_v14 = vpop.eup %2494  ;;  %1279 = vst.msk [vmem:[#allocation4 + $0x28] sm:$0xff] %vm520_vm0, %v1271_v5  ;;  %1278 = vst.msk [vmem:[#allocation4 + $0x20] sm:$0xff] %vm520_vm0, %v1270_v34  ;;  %v1053_v22 = vmul.f32 %v1044_v28, %v1005_v56  ;;  %v1052_v23 = vmul.f32 %v1039_v13, %v1004_v4 }
 0x468   : > { %v2497_v25 = vpop.eup %2496  ;;  %1904 = vperm.xlu1 %2399, %v2495_v14  }
 0x469   : > { %v1273_v16 = vadd.f32 %v2892_v9, %v1053_v22  ;;  %v1272_v15 = vadd.f32 %v2890_v35, %v1052_v23  ;;  %1899 = vperm.xlu0 %2398, %v2497_v25  }
 0x46a   : > { %v1850_v30 = vld [vmem:[#allocation4 + $0x10] sm:$0xff]  ;;  %v1851_v36 = vld [vmem:[#allocation4 + $0x18] sm:$0xff] }
 0x46b   : > { %v2499_v61 = vpop.eup %2498  ;;  %1281 = vst.msk [vmem:[#allocation4 + $0x38] sm:$0xff] %vm520_vm0, %v1273_v16  ;;  %1280 = vst.msk [vmem:[#allocation4 + $0x30] sm:$0xff] %vm520_vm0, %v1272_v15 }
 0x46d   : > { %1909 = vperm.xlu0 %2398, %v2499_v61  }
 0x46e   : > { %v1852_v46 = vld [vmem:[#allocation4 + $0x20] sm:$0xff]  ;;  %v1853_v55 = vld [vmem:[#allocation4 + $0x28] sm:$0xff] }
 0x472   : > { %v1854_v41 = vld [vmem:[#allocation4 + $0x30] sm:$0xff]  ;;  %v1855_v51 = vld [vmem:[#allocation4 + $0x38] sm:$0xff] }
 0x4db   : > { %v1875_v57 = vpop.permute.xlu1 %1874 }
 0x4dc   : > { %v1912_v62 = vmul.f32 %v1875_v57, %v1848_v52 }
 0x4df   : > { %v1885_v32 = vpop.permute.xlu1 %1884 }
 0x4e0   : > { %v1880_v27 = vpop.permute.xlu0 %1879  ;;  %v1914_v17 = vmul.f32 %v1885_v32, %v1850_v30 }
 0x4e1   : > { %v1913_v54 = vmul.f32 %v1880_v27, %v1849_v44 }
 0x4e3   : > { %v1895_v8 = vpop.permute.xlu1 %1894 }
 0x4e4   : > { %v1890_v45 = vpop.permute.xlu0 %1889  ;;  %v1916_v47 = vmul.f32 %v1895_v8, %v1852_v46 }
 0x4e5   : > { %v1915_v29 = vmul.f32 %v1890_v45, %v1851_v36 }
 0x4e7   : > { %v1905_v26 = vpop.permute.xlu1 %1904 }
 0x4e8   : > { %v1900_v19 = vpop.permute.xlu0 %1899  ;;  %v1918_v2 = vmul.f32 %v1905_v26, %v1854_v41 }
 0x4e9   : > { %v1917_v33 = vmul.f32 %v1900_v19, %v1853_v55 }
 0x4ec   : > { %v1910_v49 = vpop.permute.xlu0 %1909 }
 0x4ed   : > { %v1919_v63 = vmul.f32 %v1910_v49, %v1855_v51 }
 0x51d   : > { %v1685_v58 = vpop.f32.mrb[24].mxu0 }
 0x51e   : > { %v1920_v9 = vadd.f32 %v1912_v62, %v1685_v58  ;;  %v2350_v0 = vpop.f32.mrb[25].mxu0 }
 0x51f   : > { %v1688_v35 = vpop.f32.mrb[26].mxu0 }
 0x520   : > { %v2234_v11 = vpack.c.bf16 %v1920_v9, %v1920_v9  ;;  %v1921_v12 = vadd.f32 %v1913_v54, %v1688_v35  ;;  %v2351_v18 = vpop.f32.mrb[27].mxu0 }
 0x521   : > { %v1737_v53 = vpop.f32.mrb[24].mxu1 }
 0x522   : > { %1961 = vst.msk [vmem:[%s3052_s29] sm:$0xf] %vm1960_vm8, %v2234_v11  ;;  %v2235_v24 = vpack.c.bf16 %v1921_v12, %v1921_v12  ;;  %v1922_v40 = vadd.f32 %v1914_v17, %v1737_v53  ;;  %v2356_v43 = vpop.f32.mrb[25].mxu1 }
 0x523   : > { %v1740_v20 = vpop.f32.mrb[26].mxu1 }
 0x524   : > { %1962 = vst.msk [vmem:[%s3052_s29 + $0x4] sm:$0xf] %vm1960_vm8, %v2235_v24  ;;  %v2236_v21 = vpack.c.bf16 %v1922_v40, %v1922_v40  ;;  %v1923_v31 = vadd.f32 %v1915_v29, %v1740_v20  ;;  %v2357_v39 = vpop.f32.mrb[27].mxu1 }
 0x525   : > { %v1789_v6 = vpop.f32.mrb[28].mxu0 }
 0x526   : > { %1963 = vst.msk [vmem:[%s3052_s29 + $0x8] sm:$0xf] %vm1960_vm8, %v2236_v21  ;;  %v2237_v48 = vpack.c.bf16 %v1923_v31, %v1923_v31  ;;  %v1924_v37 = vadd.f32 %v1916_v47, %v1789_v6  ;;  %v2362_v38 = vpop.f32.mrb[29].mxu0 }
 0x527   : > { %v1792_v42 = vpop.f32.mrb[30].mxu0 }
 0x528   : > { %1964 = vst.msk [vmem:[%s3052_s29 + $0xc] sm:$0xf] %vm1960_vm8, %v2237_v48  ;;  %v2238_v10 = vpack.c.bf16 %v1924_v37, %v1924_v37  ;;  %v1925_v7 = vadd.f32 %v1917_v33, %v1792_v42  ;;  %v2363_v50 = vpop.f32.mrb[31].mxu0 }
 0x529   : > { %v1841_v59 = vpop.f32.mrb[28].mxu1 }
 0x52a   : > { %1965 = vst.msk [vmem:[%s3052_s29 + $0x10] sm:$0xf] %vm1960_vm8, %v2238_v10  ;;  %v2239_v60 = vpack.c.bf16 %v1925_v7, %v1925_v7  ;;  %v1926_v1 = vadd.f32 %v1918_v2, %v1841_v59  ;;  %v2368_v3 = vpop.f32.mrb[29].mxu1 }
 0x52b   : > { %v1844_v56 = vpop.f32.mrb[30].mxu1 }
 0x52c   : > { %1966 = vst.msk [vmem:[%s3052_s29 + $0x14] sm:$0xf] %vm1960_vm8, %v2239_v60  ;;  %v2240_v4 = vpack.c.bf16 %v1926_v1, %v1926_v1  ;;  %v1927_v5 = vadd.f32 %v1919_v63, %v1844_v56  ;;  %v2369_v34 = vpop.f32.mrb[31].mxu1 }
 0x52e   : > { %1967 = vst.msk [vmem:[%s3052_s29 + $0x18] sm:$0xf] %vm1960_vm8, %v2240_v4  ;;  %v2241_v28 = vpack.c.bf16 %v1927_v5, %v1927_v5 }
 0x530   : > { %1968 = vst.msk [vmem:[%s3052_s29 + $0x1c] sm:$0xf] %vm1960_vm8, %v2241_v28 }
 0x531 PF: > { %s15_s20 = sadd.s32 1, %s2522_s20   ;;  %s3088_s18 = smov %s2518_s19 }
 0x532   : > { %p12_p5 = scmp.ge.s32.totalorder %s15_s20, 4   ;;  %s3089_s19 = smov %s3091_s21 }
 0x534   :  { %14 = sbr.rel (!%p12_p5) target bundleno = 2 (0x2), region = 94 }

</bundles_post_ra>
